<compile_context>
chip_gen: v7x
topology: tpu7x:2x2x1
jax: 0.10.0
libtpu: 0.0.40
codegen_flags: <defaults>
</compile_context>

<pallas_src>
import functools

import jax
import jax.numpy as jnp
from jax.experimental import pallas as pl
from jax.experimental.pallas import tpu as pltpu


# ----------------------------- kernel -------------------------------------- #

def _mha(q_src, kv_src, wq_ref, bq_ref, wkv_ref, bkv_ref, wo_ref, bo_ref,
         n_heads):
    """Multi-head attention; 1/sqrt(dk) already folded into Wq/bq.

    q_src: (Sq, H) f32, kv_src: (Sk, H) f32 -> (Sq, H) f32.
    Per-head work uses static lane slices only (no transposes, no concat);
    each head is accumulated directly through its slice of W_o.
    """
    H = wq_ref.shape[1]
    dk = H // n_heads

    q = jnp.dot(q_src.astype(jnp.bfloat16), wq_ref[...],
                preferred_element_type=jnp.float32) + bq_ref[...]
    kv = jnp.dot(kv_src.astype(jnp.bfloat16), wkv_ref[...],
                 preferred_element_type=jnp.float32) + bkv_ref[...]

    q_b = q.astype(jnp.bfloat16)
    k_b = kv[:, :H].astype(jnp.bfloat16)
    v_b = kv[:, H:].astype(jnp.bfloat16)

    acc = jnp.zeros((q.shape[0], H), jnp.float32)
    for h in range(n_heads):
        sl = slice(h * dk, (h + 1) * dk)
        q_h = q_b[:, sl]                                   # (Sq, dk) bf16
        k_h = k_b[:, sl]                                   # (Sk, dk) bf16
        v_h = v_b[:, sl]                                   # (Sk, dk) bf16

        s = jnp.dot(q_h, k_h.T, preferred_element_type=jnp.float32)  # (Sq, Sk)
        # numerically-stable softmax in f32; reciprocal goes to the EUP slot
        m = jnp.max(s, axis=-1, keepdims=True)
        p = jnp.exp(s - m)
        denom = jnp.sum(p, axis=-1, keepdims=True)
        p = p * pl.reciprocal(denom, approx=True)

        ctx = jnp.dot(p.astype(jnp.bfloat16), v_h,
                      preferred_element_type=jnp.float32)             # (Sq, dk)
        # head h's slice of the output projection, accumulated in f32
        acc = acc + jnp.dot(ctx.astype(jnp.bfloat16), wo_ref[sl, :],
                            preferred_element_type=jnp.float32)       # (Sq, H)
    return acc + bo_ref[...]


def _decoder_block_kernel(
        dec_ref, enc_ref,
        # self-attention (1/sqrt(dk) folded into Wq/bq; K/V fused)
        wq_s_ref, bq_s_ref, wkv_s_ref, bkv_s_ref, wo_s_ref, bo_s_ref,
        # encoder-decoder attention
        wq_e_ref, bq_e_ref, wkv_e_ref, bkv_e_ref, wo_e_ref, bo_e_ref,
        # position-wise FFN
        w1_ref, b1_ref, w2_ref, b2_ref,
        out_ref, *, n_heads, q_tile, ff_chunk):
    """Fused decoder block for one (batch, query-tile) grid step."""
    q0 = pl.multiple_of(pl.program_id(1) * q_tile, q_tile)

    x_full = dec_ref[0]                          # (Sd, H) keys/values, self-attn
    x_q = dec_ref[0, pl.ds(q0, q_tile), :]       # (TQ, H) queries for this tile
    enc = enc_ref[0]                             # (Se, H)

    # ---- self-attention ---------------------------------------------------- #
    x = _mha(x_q, x_full, wq_s_ref, bq_s_ref, wkv_s_ref, bkv_s_ref,
             wo_s_ref, bo_s_ref, n_heads)

    # ---- encoder-decoder attention ----------------------------------------- #
    x = _mha(x, enc, wq_e_ref, bq_e_ref, wkv_e_ref, bkv_e_ref,
             wo_e_ref, bo_e_ref, n_heads)

    # ---- position-wise FFN, chunked over d_ff ------------------------------ #
    x_b = x.astype(jnp.bfloat16)
    d_ff = w1_ref.shape[1]
    n_chunks = d_ff // ff_chunk
    acc = jnp.zeros_like(x)                       # (TQ, H) f32
    for c in range(n_chunks):
        cs = slice(c * ff_chunk, (c + 1) * ff_chunk)
        h = jnp.dot(x_b, w1_ref[:, cs],
                    preferred_element_type=jnp.float32) + b1_ref[:, cs]
        # GELU (tanh approximation, as in BERT-pytorch's GELU module), f32
        h = 0.5 * h * (1.0 + jnp.tanh(
            0.7978845608028654 * (h + 0.044715 * h * h * h)))
        acc = acc + jnp.dot(h.astype(jnp.bfloat16), w2_ref[cs, :],
                            preferred_element_type=jnp.float32)

    out_ref[0] = (acc + b2_ref[...]).astype(out_ref.dtype)


# ----------------------------- weight packing ------------------------------- #

def pack_params(params, n_heads):
    """One-time fusion: fold 1/sqrt(dk) into Wq/bq, fuse K/V, cast weights to
    bf16 (biases stay f32). Do this once, outside the per-call path."""
    def w(x):
        return x.astype(jnp.bfloat16)

    def pack_mha(p):
        wq, bq, wk, bk, wv, bv, wo, bo = p
        H = wq.shape[0]
        scale = 1.0 / ((H // n_heads) ** 0.5)
        wkv = jnp.concatenate([wk, wv], axis=1)            # (H, 2H)
        bkv = jnp.concatenate([bk, bv], axis=1)            # (1, 2H)
        return (w(wq * scale), (bq * scale).astype(jnp.float32),
                w(wkv), bkv.astype(jnp.float32),
                w(wo), bo.astype(jnp.float32))

    w1, b1, w2, b2 = params["ffn"]
    return (pack_mha(params["self_attn"])
            + pack_mha(params["enc_attn"])
            + (w(w1), b1.astype(jnp.float32), w(w2), b2.astype(jnp.float32)))


# ----------------------------- wrapper -------------------------------------- #

def _rep_spec(arr):
    """Whole (replicated) parameter, single-buffered — the constant index_map
    already skips re-copies; Buffered(1) halves its VMEM footprint."""
    return pl.BlockSpec(arr.shape, lambda b, q: (0, 0),
                        pipeline_mode=pl.Buffered(1))


def transformer_decoder_block(dec_input, enc_output, packed, n_heads,
                              *, q_tile=None, ff_chunk=None):
    """dec_input: (B, Sd, H), enc_output: (B, Se, H) -> (B, Sd, H) f32."""
    B, Sd, H = dec_input.shape
    _, Se, _ = enc_output.shape
    d_ff = packed[12].shape[1]                    # w1 is (H, d_ff)

    if q_tile is None:                            # query-tile size (lane-friendly)
        q_tile = Sd
        for cand in (256, 128):
            if Sd % cand == 0:
                q_tile = cand
                break
    assert Sd % q_tile == 0

    if ff_chunk is None:                          # d_ff chunk for the FFN
        ff_chunk = d_ff
        for cand in (1024, 512, 256):
            if d_ff % cand == 0 and d_ff > cand:
                ff_chunk = cand
                break
    assert d_ff % ff_chunk == 0

    # ---- explicit VMEM budget from the actual resident set ----------------- #
    def _nbytes(a):
        return a.size * a.dtype.itemsize
    weight_bytes = sum(_nbytes(a) for a in packed)              # Buffered(1)
    io_bytes = 2 * 4 * (Sd * H + Se * H + q_tile * H)           # dbl-buffered f32
    sk = max(Sd, Se)
    work_bytes = 4 * (Sd * 2 * H                                # fused KV proj
                      + q_tile * (2 * H + sk)                   # q, acc, scores
                      + q_tile * ff_chunk                       # FFN hidden chunk
                      + q_tile * 2 * H)                         # bf16 copies/slack
    vmem_limit = max(32 * 1024 * 1024,
                     int(1.5 * (weight_bytes + io_bytes + work_bytes)))

    kernel = functools.partial(_decoder_block_kernel, n_heads=n_heads,
                               q_tile=q_tile, ff_chunk=ff_chunk)
    return pl.pallas_call(
        kernel,
        out_shape=jax.ShapeDtypeStruct((B, Sd, H), jnp.float32),
        grid_spec=pltpu.PrefetchScalarGridSpec(
            num_scalar_prefetch=0,
            grid=(B, Sd // q_tile),
            in_specs=[
                pl.BlockSpec((1, Sd, H), lambda b, q: (b, 0, 0)),
                pl.BlockSpec((1, Se, H), lambda b, q: (b, 0, 0)),
            ] + [_rep_spec(w) for w in packed],
            out_specs=pl.BlockSpec((1, q_tile, H), lambda b, q: (b, q, 0)),
        ),
        compiler_params=pltpu.CompilerParams(
            dimension_semantics=("parallel", "parallel"),
            vmem_limit_bytes=vmem_limit),
    )(dec_input, enc_output, *packed)


# ----------------------------- param init ----------------------------------- #

def init_params(key, hidden, n_heads, d_ff):
    def linear(k, fan_in, fan_out):
        k1, k2 = jax.random.split(k)
        lim = 1.0 / (fan_in ** 0.5)
        w = jax.random.uniform(k1, (fan_in, fan_out), jnp.float32, -lim, lim)
        b = jax.random.uniform(k2, (1, fan_out), jnp.float32, -lim, lim)
        return w, b

    keys = jax.random.split(key, 10)

    def mha_params(ks):
        wq, bq = linear(ks[0], hidden, hidden)
        wk, bk = linear(ks[1], hidden, hidden)
        wv, bv = linear(ks[2], hidden, hidden)
        wo, bo = linear(ks[3], hidden, hidden)
        return (wq, bq, wk, bk, wv, bv, wo, bo)

    w1, b1 = linear(keys[8], hidden, d_ff)
    w2, b2 = linear(keys[9], d_ff, hidden)
    return {
        "self_attn": mha_params(keys[0:4]),
        "enc_attn": mha_params(keys[4:8]),
        "ffn": (w1, b1, w2, b2),
    }


# ----------------------------- main ------------------------------------------ #

if __name__ == "__main__":
    B, S_DEC, S_ENC = 2, 8, 8
    HIDDEN, HEADS = 32, 4
    FF = 4 * HIDDEN
    DROPOUT = 0.1  # identity at inference -> omitted

    key = jax.random.PRNGKey(0)
    k_p, k_x, k_e = jax.random.split(key, 3)
    params = init_params(k_p, HIDDEN, HEADS, FF)
    packed = pack_params(params, HEADS)           # one-time weight fusion

    dec_input = jax.random.normal(k_x, (B, S_DEC, HIDDEN), jnp.float32)
    enc_output = jax.random.normal(k_e, (B, S_ENC, HIDDEN), jnp.float32)

    out = transformer_decoder_block(dec_input, enc_output, packed, HEADS)
    out = jax.block_until_ready(out)
    assert out.shape == (B, S_DEC, HIDDEN)
    print("KERNEL_OK")
</pallas_src>

<mosaic_0001>
module attributes {stable_mosaic.version = 11 : i64} {
  func.func @_decoder_block_kernel(%arg0: i32, %arg1: i32, %arg2: memref<1x8x32xf32, #tpu.memory_space<vmem>>, %arg3: memref<1x8x32xf32, #tpu.memory_space<vmem>>, %arg4: memref<32x32xbf16, #tpu.memory_space<vmem>>, %arg5: memref<1x32xf32, #tpu.memory_space<vmem>>, %arg6: memref<32x64xbf16, #tpu.memory_space<vmem>>, %arg7: memref<1x64xf32, #tpu.memory_space<vmem>>, %arg8: memref<32x32xbf16, #tpu.memory_space<vmem>>, %arg9: memref<1x32xf32, #tpu.memory_space<vmem>>, %arg10: memref<32x32xbf16, #tpu.memory_space<vmem>>, %arg11: memref<1x32xf32, #tpu.memory_space<vmem>>, %arg12: memref<32x64xbf16, #tpu.memory_space<vmem>>, %arg13: memref<1x64xf32, #tpu.memory_space<vmem>>, %arg14: memref<32x32xbf16, #tpu.memory_space<vmem>>, %arg15: memref<1x32xf32, #tpu.memory_space<vmem>>, %arg16: memref<32x128xbf16, #tpu.memory_space<vmem>>, %arg17: memref<1x128xf32, #tpu.memory_space<vmem>>, %arg18: memref<128x32xbf16, #tpu.memory_space<vmem>>, %arg19: memref<1x32xf32, #tpu.memory_space<vmem>>, %arg20: memref<1x8x32xf32, #tpu.memory_space<vmem>>) attributes {dimension_semantics = [#tpu.dimension_semantics<parallel>, #tpu.dimension_semantics<parallel>], iteration_bounds = array<i64: 2, 1>, scalar_prefetch = 0 : i64, scratch_operands = 0 : i64, tpu.core_type = #tpu.core_type<tc>, window_params = [{transform_indices = @transform_0, window_bounds = array<i64: 1, 8, 32>}, {transform_indices = @transform_1, window_bounds = array<i64: 1, 8, 32>}, {pipeline_mode = #tpu.pipeline_mode<synchronous>, transform_indices = @transform_2, window_bounds = array<i64: 32, 32>}, {pipeline_mode = #tpu.pipeline_mode<synchronous>, transform_indices = @transform_3, window_bounds = array<i64: 1, 32>}, {pipeline_mode = #tpu.pipeline_mode<synchronous>, transform_indices = @transform_4, window_bounds = array<i64: 32, 64>}, {pipeline_mode = #tpu.pipeline_mode<synchronous>, transform_indices = @transform_5, window_bounds = array<i64: 1, 64>}, {pipeline_mode = #tpu.pipeline_mode<synchronous>, transform_indices = @transform_6, window_bounds = array<i64: 32, 32>}, {pipeline_mode = #tpu.pipeline_mode<synchronous>, transform_indices = @transform_7, window_bounds = array<i64: 1, 32>}, {pipeline_mode = #tpu.pipeline_mode<synchronous>, transform_indices = @transform_8, window_bounds = array<i64: 32, 32>}, {pipeline_mode = #tpu.pipeline_mode<synchronous>, transform_indices = @transform_9, window_bounds = array<i64: 1, 32>}, {pipeline_mode = #tpu.pipeline_mode<synchronous>, transform_indices = @transform_10, window_bounds = array<i64: 32, 64>}, {pipeline_mode = #tpu.pipeline_mode<synchronous>, transform_indices = @transform_11, window_bounds = array<i64: 1, 64>}, {pipeline_mode = #tpu.pipeline_mode<synchronous>, transform_indices = @transform_12, window_bounds = array<i64: 32, 32>}, {pipeline_mode = #tpu.pipeline_mode<synchronous>, transform_indices = @transform_13, window_bounds = array<i64: 1, 32>}, {pipeline_mode = #tpu.pipeline_mode<synchronous>, transform_indices = @transform_14, window_bounds = array<i64: 32, 128>}, {pipeline_mode = #tpu.pipeline_mode<synchronous>, transform_indices = @transform_15, window_bounds = array<i64: 1, 128>}, {pipeline_mode = #tpu.pipeline_mode<synchronous>, transform_indices = @transform_16, window_bounds = array<i64: 128, 32>}, {pipeline_mode = #tpu.pipeline_mode<synchronous>, transform_indices = @transform_17, window_bounds = array<i64: 1, 32>}, {transform_indices = @transform_18, window_bounds = array<i64: 1, 8, 32>}]} {
    %c8_i32 = arith.constant 8 : i32
    %0 = arith.muli %arg1, %c8_i32 : i32
    %1 = tpu.assume_multiple %0, 8 : i32
    %c0 = arith.constant 0 : index
    %c0_0 = arith.constant 0 : index
    %c0_1 = arith.constant 0 : index
    %2 = vector.load %arg2[%c0, %c0_0, %c0_1] : memref<1x8x32xf32, #tpu.memory_space<vmem>>, vector<1x8x32xf32>
    %3 = vector.shape_cast %2 : vector<1x8x32xf32> to vector<8x32xf32>
    %c0_2 = arith.constant 0 : index
    %4 = arith.index_cast %1 : i32 to index
    %c0_3 = arith.constant 0 : index
    %5 = vector.load %arg2[%c0_2, %4, %c0_3] : memref<1x8x32xf32, #tpu.memory_space<vmem>>, vector<1x8x32xf32>
    %6 = vector.shape_cast %5 : vector<1x8x32xf32> to vector<8x32xf32>
    %c0_4 = arith.constant 0 : index
    %c0_5 = arith.constant 0 : index
    %c0_6 = arith.constant 0 : index
    %7 = vector.load %arg3[%c0_4, %c0_5, %c0_6] : memref<1x8x32xf32, #tpu.memory_space<vmem>>, vector<1x8x32xf32>
    %8 = vector.shape_cast %7 : vector<1x8x32xf32> to vector<8x32xf32>
    %9 = arith.truncf %6 : vector<8x32xf32> to vector<8x32xbf16>
    %c0_7 = arith.constant 0 : index
    %c0_8 = arith.constant 0 : index
    %10 = vector.load %arg4[%c0_7, %c0_8] : memref<32x32xbf16, #tpu.memory_space<vmem>>, vector<32x32xbf16>
    %cst = arith.constant dense<0.000000e+00> : vector<8x32xf32>
    %11 = tpu.matmul %9, %10, %cst {dimension_numbers = #tpu.dot_dimension_numbers<[1], [0], [0], [1], [0, 0, 1, 1], [], []>} : vector<8x32xbf16>, vector<32x32xbf16>, vector<8x32xf32> -> vector<8x32xf32>
    %c0_9 = arith.constant 0 : index
    %c0_10 = arith.constant 0 : index
    %12 = vector.load %arg5[%c0_9, %c0_10] : memref<1x32xf32, #tpu.memory_space<vmem>>, vector<1x32xf32>
    %13 = vector.broadcast %12 : vector<1x32xf32> to vector<8x32xf32>
    %14 = arith.addf %11, %13 : vector<8x32xf32>
    %15 = arith.truncf %3 : vector<8x32xf32> to vector<8x32xbf16>
    %c0_11 = arith.constant 0 : index
    %c0_12 = arith.constant 0 : index
    %16 = vector.load %arg6[%c0_11, %c0_12] : memref<32x64xbf16, #tpu.memory_space<vmem>>, vector<32x64xbf16>
    %cst_13 = arith.constant dense<0.000000e+00> : vector<8x64xf32>
    %17 = tpu.matmul %15, %16, %cst_13 {dimension_numbers = #tpu.dot_dimension_numbers<[1], [0], [0], [1], [0, 0, 1, 1], [], []>} : vector<8x32xbf16>, vector<32x64xbf16>, vector<8x64xf32> -> vector<8x64xf32>
    %c0_14 = arith.constant 0 : index
    %c0_15 = arith.constant 0 : index
    %18 = vector.load %arg7[%c0_14, %c0_15] : memref<1x64xf32, #tpu.memory_space<vmem>>, vector<1x64xf32>
    %19 = vector.broadcast %18 : vector<1x64xf32> to vector<8x64xf32>
    %20 = arith.addf %17, %19 : vector<8x64xf32>
    %21 = arith.truncf %14 : vector<8x32xf32> to vector<8x32xbf16>
    %22 = vector.extract_strided_slice %20 {offsets = [0, 0], sizes = [8, 32], strides = [1, 1]} : vector<8x64xf32> to vector<8x32xf32>
    %23 = arith.truncf %22 : vector<8x32xf32> to vector<8x32xbf16>
    %24 = vector.extract_strided_slice %20 {offsets = [0, 32], sizes = [8, 32], strides = [1, 1]} : vector<8x64xf32> to vector<8x32xf32>
    %25 = arith.truncf %24 : vector<8x32xf32> to vector<8x32xbf16>
    %cst_16 = arith.constant 0.000000e+00 : f32
    %26 = vector.broadcast %cst_16 : f32 to vector<8x32xf32>
    %27 = vector.extract_strided_slice %21 {offsets = [0, 0], sizes = [8, 8], strides = [1, 1]} : vector<8x32xbf16> to vector<8x8xbf16>
    %28 = vector.extract_strided_slice %23 {offsets = [0, 0], sizes = [8, 8], strides = [1, 1]} : vector<8x32xbf16> to vector<8x8xbf16>
    %29 = vector.extract_strided_slice %25 {offsets = [0, 0], sizes = [8, 8], strides = [1, 1]} : vector<8x32xbf16> to vector<8x8xbf16>
    %30 = tpu.transpose %28, [1, 0] : vector<8x8xbf16> -> vector<8x8xbf16>
    %cst_17 = arith.constant dense<0.000000e+00> : vector<8x8xf32>
    %31 = tpu.matmul %27, %30, %cst_17 {dimension_numbers = #tpu.dot_dimension_numbers<[1], [0], [0], [1], [0, 0, 1, 1], [], []>} : vector<8x8xbf16>, vector<8x8xbf16>, vector<8x8xf32> -> vector<8x8xf32>
    %cst_18 = arith.constant dense<0xFF800000> : vector<8xf32>
    %32 = vector.multi_reduction <maximumf>, %31, %cst_18 [1] : vector<8x8xf32> to vector<8xf32>
    %33 = vector.shape_cast %32 : vector<8xf32> to vector<8x1xf32>
    %34 = vector.broadcast %33 : vector<8x1xf32> to vector<8x8xf32>
    %35 = arith.subf %31, %34 : vector<8x8xf32>
    %36 = math.exp %35 : vector<8x8xf32>
    %cst_19 = arith.constant dense<0.000000e+00> : vector<8xf32>
    %37 = vector.multi_reduction <add>, %36, %cst_19 [1] : vector<8x8xf32> to vector<8xf32>
    %38 = vector.shape_cast %37 : vector<8xf32> to vector<8x1xf32>
    %39 = tpu.reciprocal %38 {approx = true} : vector<8x1xf32> -> vector<8x1xf32>
    %40 = vector.broadcast %39 : vector<8x1xf32> to vector<8x8xf32>
    %41 = arith.mulf %36, %40 : vector<8x8xf32>
    %42 = arith.truncf %41 : vector<8x8xf32> to vector<8x8xbf16>
    %cst_20 = arith.constant dense<0.000000e+00> : vector<8x8xf32>
    %43 = tpu.matmul %42, %29, %cst_20 {dimension_numbers = #tpu.dot_dimension_numbers<[1], [0], [0], [1], [0, 0, 1, 1], [], []>} : vector<8x8xbf16>, vector<8x8xbf16>, vector<8x8xf32> -> vector<8x8xf32>
    %44 = arith.truncf %43 : vector<8x8xf32> to vector<8x8xbf16>
    %c0_21 = arith.constant 0 : index
    %c0_22 = arith.constant 0 : index
    %45 = vector.load %arg8[%c0_21, %c0_22] : memref<32x32xbf16, #tpu.memory_space<vmem>>, vector<8x32xbf16>
    %cst_23 = arith.constant dense<0.000000e+00> : vector<8x32xf32>
    %46 = tpu.matmul %44, %45, %cst_23 {dimension_numbers = #tpu.dot_dimension_numbers<[1], [0], [0], [1], [0, 0, 1, 1], [], []>} : vector<8x8xbf16>, vector<8x32xbf16>, vector<8x32xf32> -> vector<8x32xf32>
    %47 = arith.addf %26, %46 : vector<8x32xf32>
    %48 = vector.extract_strided_slice %21 {offsets = [0, 8], sizes = [8, 8], strides = [1, 1]} : vector<8x32xbf16> to vector<8x8xbf16>
    %49 = vector.extract_strided_slice %23 {offsets = [0, 8], sizes = [8, 8], strides = [1, 1]} : vector<8x32xbf16> to vector<8x8xbf16>
    %50 = vector.extract_strided_slice %25 {offsets = [0, 8], sizes = [8, 8], strides = [1, 1]} : vector<8x32xbf16> to vector<8x8xbf16>
    %51 = tpu.transpose %49, [1, 0] : vector<8x8xbf16> -> vector<8x8xbf16>
    %cst_24 = arith.constant dense<0.000000e+00> : vector<8x8xf32>
    %52 = tpu.matmul %48, %51, %cst_24 {dimension_numbers = #tpu.dot_dimension_numbers<[1], [0], [0], [1], [0, 0, 1, 1], [], []>} : vector<8x8xbf16>, vector<8x8xbf16>, vector<8x8xf32> -> vector<8x8xf32>
    %cst_25 = arith.constant dense<0xFF800000> : vector<8xf32>
    %53 = vector.multi_reduction <maximumf>, %52, %cst_25 [1] : vector<8x8xf32> to vector<8xf32>
    %54 = vector.shape_cast %53 : vector<8xf32> to vector<8x1xf32>
    %55 = vector.broadcast %54 : vector<8x1xf32> to vector<8x8xf32>
    %56 = arith.subf %52, %55 : vector<8x8xf32>
    %57 = math.exp %56 : vector<8x8xf32>
    %cst_26 = arith.constant dense<0.000000e+00> : vector<8xf32>
    %58 = vector.multi_reduction <add>, %57, %cst_26 [1] : vector<8x8xf32> to vector<8xf32>
    %59 = vector.shape_cast %58 : vector<8xf32> to vector<8x1xf32>
    %60 = tpu.reciprocal %59 {approx = true} : vector<8x1xf32> -> vector<8x1xf32>
    %61 = vector.broadcast %60 : vector<8x1xf32> to vector<8x8xf32>
    %62 = arith.mulf %57, %61 : vector<8x8xf32>
    %63 = arith.truncf %62 : vector<8x8xf32> to vector<8x8xbf16>
    %cst_27 = arith.constant dense<0.000000e+00> : vector<8x8xf32>
    %64 = tpu.matmul %63, %50, %cst_27 {dimension_numbers = #tpu.dot_dimension_numbers<[1], [0], [0], [1], [0, 0, 1, 1], [], []>} : vector<8x8xbf16>, vector<8x8xbf16>, vector<8x8xf32> -> vector<8x8xf32>
    %65 = arith.truncf %64 : vector<8x8xf32> to vector<8x8xbf16>
    %c8 = arith.constant 8 : index
    %c0_28 = arith.constant 0 : index
    %66 = vector.load %arg8[%c8, %c0_28] : memref<32x32xbf16, #tpu.memory_space<vmem>>, vector<8x32xbf16>
    %cst_29 = arith.constant dense<0.000000e+00> : vector<8x32xf32>
    %67 = tpu.matmul %65, %66, %cst_29 {dimension_numbers = #tpu.dot_dimension_numbers<[1], [0], [0], [1], [0, 0, 1, 1], [], []>} : vector<8x8xbf16>, vector<8x32xbf16>, vector<8x32xf32> -> vector<8x32xf32>
    %68 = arith.addf %47, %67 : vector<8x32xf32>
    %69 = vector.extract_strided_slice %21 {offsets = [0, 16], sizes = [8, 8], strides = [1, 1]} : vector<8x32xbf16> to vector<8x8xbf16>
    %70 = vector.extract_strided_slice %23 {offsets = [0, 16], sizes = [8, 8], strides = [1, 1]} : vector<8x32xbf16> to vector<8x8xbf16>
    %71 = vector.extract_strided_slice %25 {offsets = [0, 16], sizes = [8, 8], strides = [1, 1]} : vector<8x32xbf16> to vector<8x8xbf16>
    %72 = tpu.transpose %70, [1, 0] : vector<8x8xbf16> -> vector<8x8xbf16>
    %cst_30 = arith.constant dense<0.000000e+00> : vector<8x8xf32>
    %73 = tpu.matmul %69, %72, %cst_30 {dimension_numbers = #tpu.dot_dimension_numbers<[1], [0], [0], [1], [0, 0, 1, 1], [], []>} : vector<8x8xbf16>, vector<8x8xbf16>, vector<8x8xf32> -> vector<8x8xf32>
    %cst_31 = arith.constant dense<0xFF800000> : vector<8xf32>
    %74 = vector.multi_reduction <maximumf>, %73, %cst_31 [1] : vector<8x8xf32> to vector<8xf32>
    %75 = vector.shape_cast %74 : vector<8xf32> to vector<8x1xf32>
    %76 = vector.broadcast %75 : vector<8x1xf32> to vector<8x8xf32>
    %77 = arith.subf %73, %76 : vector<8x8xf32>
    %78 = math.exp %77 : vector<8x8xf32>
    %cst_32 = arith.constant dense<0.000000e+00> : vector<8xf32>
    %79 = vector.multi_reduction <add>, %78, %cst_32 [1] : vector<8x8xf32> to vector<8xf32>
    %80 = vector.shape_cast %79 : vector<8xf32> to vector<8x1xf32>
    %81 = tpu.reciprocal %80 {approx = true} : vector<8x1xf32> -> vector<8x1xf32>
    %82 = vector.broadcast %81 : vector<8x1xf32> to vector<8x8xf32>
    %83 = arith.mulf %78, %82 : vector<8x8xf32>
    %84 = arith.truncf %83 : vector<8x8xf32> to vector<8x8xbf16>
    %cst_33 = arith.constant dense<0.000000e+00> : vector<8x8xf32>
    %85 = tpu.matmul %84, %71, %cst_33 {dimension_numbers = #tpu.dot_dimension_numbers<[1], [0], [0], [1], [0, 0, 1, 1], [], []>} : vector<8x8xbf16>, vector<8x8xbf16>, vector<8x8xf32> -> vector<8x8xf32>
    %86 = arith.truncf %85 : vector<8x8xf32> to vector<8x8xbf16>
    %c16 = arith.constant 16 : index
    %c0_34 = arith.constant 0 : index
    %87 = vector.load %arg8[%c16, %c0_34] : memref<32x32xbf16, #tpu.memory_space<vmem>>, vector<8x32xbf16>
    %cst_35 = arith.constant dense<0.000000e+00> : vector<8x32xf32>
    %88 = tpu.matmul %86, %87, %cst_35 {dimension_numbers = #tpu.dot_dimension_numbers<[1], [0], [0], [1], [0, 0, 1, 1], [], []>} : vector<8x8xbf16>, vector<8x32xbf16>, vector<8x32xf32> -> vector<8x32xf32>
    %89 = arith.addf %68, %88 : vector<8x32xf32>
    %90 = vector.extract_strided_slice %21 {offsets = [0, 24], sizes = [8, 8], strides = [1, 1]} : vector<8x32xbf16> to vector<8x8xbf16>
    %91 = vector.extract_strided_slice %23 {offsets = [0, 24], sizes = [8, 8], strides = [1, 1]} : vector<8x32xbf16> to vector<8x8xbf16>
    %92 = vector.extract_strided_slice %25 {offsets = [0, 24], sizes = [8, 8], strides = [1, 1]} : vector<8x32xbf16> to vector<8x8xbf16>
    %93 = tpu.transpose %91, [1, 0] : vector<8x8xbf16> -> vector<8x8xbf16>
    %cst_36 = arith.constant dense<0.000000e+00> : vector<8x8xf32>
    %94 = tpu.matmul %90, %93, %cst_36 {dimension_numbers = #tpu.dot_dimension_numbers<[1], [0], [0], [1], [0, 0, 1, 1], [], []>} : vector<8x8xbf16>, vector<8x8xbf16>, vector<8x8xf32> -> vector<8x8xf32>
    %cst_37 = arith.constant dense<0xFF800000> : vector<8xf32>
    %95 = vector.multi_reduction <maximumf>, %94, %cst_37 [1] : vector<8x8xf32> to vector<8xf32>
    %96 = vector.shape_cast %95 : vector<8xf32> to vector<8x1xf32>
    %97 = vector.broadcast %96 : vector<8x1xf32> to vector<8x8xf32>
    %98 = arith.subf %94, %97 : vector<8x8xf32>
    %99 = math.exp %98 : vector<8x8xf32>
    %cst_38 = arith.constant dense<0.000000e+00> : vector<8xf32>
    %100 = vector.multi_reduction <add>, %99, %cst_38 [1] : vector<8x8xf32> to vector<8xf32>
    %101 = vector.shape_cast %100 : vector<8xf32> to vector<8x1xf32>
    %102 = tpu.reciprocal %101 {approx = true} : vector<8x1xf32> -> vector<8x1xf32>
    %103 = vector.broadcast %102 : vector<8x1xf32> to vector<8x8xf32>
    %104 = arith.mulf %99, %103 : vector<8x8xf32>
    %105 = arith.truncf %104 : vector<8x8xf32> to vector<8x8xbf16>
    %cst_39 = arith.constant dense<0.000000e+00> : vector<8x8xf32>
    %106 = tpu.matmul %105, %92, %cst_39 {dimension_numbers = #tpu.dot_dimension_numbers<[1], [0], [0], [1], [0, 0, 1, 1], [], []>} : vector<8x8xbf16>, vector<8x8xbf16>, vector<8x8xf32> -> vector<8x8xf32>
    %107 = arith.truncf %106 : vector<8x8xf32> to vector<8x8xbf16>
    %c24 = arith.constant 24 : index
    %c0_40 = arith.constant 0 : index
    %108 = vector.load %arg8[%c24, %c0_40] : memref<32x32xbf16, #tpu.memory_space<vmem>>, vector<8x32xbf16>
    %cst_41 = arith.constant dense<0.000000e+00> : vector<8x32xf32>
    %109 = tpu.matmul %107, %108, %cst_41 {dimension_numbers = #tpu.dot_dimension_numbers<[1], [0], [0], [1], [0, 0, 1, 1], [], []>} : vector<8x8xbf16>, vector<8x32xbf16>, vector<8x32xf32> -> vector<8x32xf32>
    %110 = arith.addf %89, %109 : vector<8x32xf32>
    %c0_42 = arith.constant 0 : index
    %c0_43 = arith.constant 0 : index
    %111 = vector.load %arg9[%c0_42, %c0_43] : memref<1x32xf32, #tpu.memory_space<vmem>>, vector<1x32xf32>
    %112 = vector.broadcast %111 : vector<1x32xf32> to vector<8x32xf32>
    %113 = arith.addf %110, %112 : vector<8x32xf32>
    %114 = arith.truncf %113 : vector<8x32xf32> to vector<8x32xbf16>
    %c0_44 = arith.constant 0 : index
    %c0_45 = arith.constant 0 : index
    %115 = vector.load %arg10[%c0_44, %c0_45] : memref<32x32xbf16, #tpu.memory_space<vmem>>, vector<32x32xbf16>
    %cst_46 = arith.constant dense<0.000000e+00> : vector<8x32xf32>
    %116 = tpu.matmul %114, %115, %cst_46 {dimension_numbers = #tpu.dot_dimension_numbers<[1], [0], [0], [1], [0, 0, 1, 1], [], []>} : vector<8x32xbf16>, vector<32x32xbf16>, vector<8x32xf32> -> vector<8x32xf32>
    %c0_47 = arith.constant 0 : index
    %c0_48 = arith.constant 0 : index
    %117 = vector.load %arg11[%c0_47, %c0_48] : memref<1x32xf32, #tpu.memory_space<vmem>>, vector<1x32xf32>
    %118 = vector.broadcast %117 : vector<1x32xf32> to vector<8x32xf32>
    %119 = arith.addf %116, %118 : vector<8x32xf32>
    %120 = arith.truncf %8 : vector<8x32xf32> to vector<8x32xbf16>
    %c0_49 = arith.constant 0 : index
    %c0_50 = arith.constant 0 : index
    %121 = vector.load %arg12[%c0_49, %c0_50] : memref<32x64xbf16, #tpu.memory_space<vmem>>, vector<32x64xbf16>
    %cst_51 = arith.constant dense<0.000000e+00> : vector<8x64xf32>
    %122 = tpu.matmul %120, %121, %cst_51 {dimension_numbers = #tpu.dot_dimension_numbers<[1], [0], [0], [1], [0, 0, 1, 1], [], []>} : vector<8x32xbf16>, vector<32x64xbf16>, vector<8x64xf32> -> vector<8x64xf32>
    %c0_52 = arith.constant 0 : index
    %c0_53 = arith.constant 0 : index
    %123 = vector.load %arg13[%c0_52, %c0_53] : memref<1x64xf32, #tpu.memory_space<vmem>>, vector<1x64xf32>
    %124 = vector.broadcast %123 : vector<1x64xf32> to vector<8x64xf32>
    %125 = arith.addf %122, %124 : vector<8x64xf32>
    %126 = arith.truncf %119 : vector<8x32xf32> to vector<8x32xbf16>
    %127 = vector.extract_strided_slice %125 {offsets = [0, 0], sizes = [8, 32], strides = [1, 1]} : vector<8x64xf32> to vector<8x32xf32>
    %128 = arith.truncf %127 : vector<8x32xf32> to vector<8x32xbf16>
    %129 = vector.extract_strided_slice %125 {offsets = [0, 32], sizes = [8, 32], strides = [1, 1]} : vector<8x64xf32> to vector<8x32xf32>
    %130 = arith.truncf %129 : vector<8x32xf32> to vector<8x32xbf16>
    %cst_54 = arith.constant 0.000000e+00 : f32
    %131 = vector.broadcast %cst_54 : f32 to vector<8x32xf32>
    %132 = vector.extract_strided_slice %126 {offsets = [0, 0], sizes = [8, 8], strides = [1, 1]} : vector<8x32xbf16> to vector<8x8xbf16>
    %133 = vector.extract_strided_slice %128 {offsets = [0, 0], sizes = [8, 8], strides = [1, 1]} : vector<8x32xbf16> to vector<8x8xbf16>
    %134 = vector.extract_strided_slice %130 {offsets = [0, 0], sizes = [8, 8], strides = [1, 1]} : vector<8x32xbf16> to vector<8x8xbf16>
    %135 = tpu.transpose %133, [1, 0] : vector<8x8xbf16> -> vector<8x8xbf16>
    %cst_55 = arith.constant dense<0.000000e+00> : vector<8x8xf32>
    %136 = tpu.matmul %132, %135, %cst_55 {dimension_numbers = #tpu.dot_dimension_numbers<[1], [0], [0], [1], [0, 0, 1, 1], [], []>} : vector<8x8xbf16>, vector<8x8xbf16>, vector<8x8xf32> -> vector<8x8xf32>
    %cst_56 = arith.constant dense<0xFF800000> : vector<8xf32>
    %137 = vector.multi_reduction <maximumf>, %136, %cst_56 [1] : vector<8x8xf32> to vector<8xf32>
    %138 = vector.shape_cast %137 : vector<8xf32> to vector<8x1xf32>
    %139 = vector.broadcast %138 : vector<8x1xf32> to vector<8x8xf32>
    %140 = arith.subf %136, %139 : vector<8x8xf32>
    %141 = math.exp %140 : vector<8x8xf32>
    %cst_57 = arith.constant dense<0.000000e+00> : vector<8xf32>
    %142 = vector.multi_reduction <add>, %141, %cst_57 [1] : vector<8x8xf32> to vector<8xf32>
    %143 = vector.shape_cast %142 : vector<8xf32> to vector<8x1xf32>
    %144 = tpu.reciprocal %143 {approx = true} : vector<8x1xf32> -> vector<8x1xf32>
    %145 = vector.broadcast %144 : vector<8x1xf32> to vector<8x8xf32>
    %146 = arith.mulf %141, %145 : vector<8x8xf32>
    %147 = arith.truncf %146 : vector<8x8xf32> to vector<8x8xbf16>
    %cst_58 = arith.constant dense<0.000000e+00> : vector<8x8xf32>
    %148 = tpu.matmul %147, %134, %cst_58 {dimension_numbers = #tpu.dot_dimension_numbers<[1], [0], [0], [1], [0, 0, 1, 1], [], []>} : vector<8x8xbf16>, vector<8x8xbf16>, vector<8x8xf32> -> vector<8x8xf32>
    %149 = arith.truncf %148 : vector<8x8xf32> to vector<8x8xbf16>
    %c0_59 = arith.constant 0 : index
    %c0_60 = arith.constant 0 : index
    %150 = vector.load %arg14[%c0_59, %c0_60] : memref<32x32xbf16, #tpu.memory_space<vmem>>, vector<8x32xbf16>
    %cst_61 = arith.constant dense<0.000000e+00> : vector<8x32xf32>
    %151 = tpu.matmul %149, %150, %cst_61 {dimension_numbers = #tpu.dot_dimension_numbers<[1], [0], [0], [1], [0, 0, 1, 1], [], []>} : vector<8x8xbf16>, vector<8x32xbf16>, vector<8x32xf32> -> vector<8x32xf32>
    %152 = arith.addf %131, %151 : vector<8x32xf32>
    %153 = vector.extract_strided_slice %126 {offsets = [0, 8], sizes = [8, 8], strides = [1, 1]} : vector<8x32xbf16> to vector<8x8xbf16>
    %154 = vector.extract_strided_slice %128 {offsets = [0, 8], sizes = [8, 8], strides = [1, 1]} : vector<8x32xbf16> to vector<8x8xbf16>
    %155 = vector.extract_strided_slice %130 {offsets = [0, 8], sizes = [8, 8], strides = [1, 1]} : vector<8x32xbf16> to vector<8x8xbf16>
    %156 = tpu.transpose %154, [1, 0] : vector<8x8xbf16> -> vector<8x8xbf16>
    %cst_62 = arith.constant dense<0.000000e+00> : vector<8x8xf32>
    %157 = tpu.matmul %153, %156, %cst_62 {dimension_numbers = #tpu.dot_dimension_numbers<[1], [0], [0], [1], [0, 0, 1, 1], [], []>} : vector<8x8xbf16>, vector<8x8xbf16>, vector<8x8xf32> -> vector<8x8xf32>
    %cst_63 = arith.constant dense<0xFF800000> : vector<8xf32>
    %158 = vector.multi_reduction <maximumf>, %157, %cst_63 [1] : vector<8x8xf32> to vector<8xf32>
    %159 = vector.shape_cast %158 : vector<8xf32> to vector<8x1xf32>
    %160 = vector.broadcast %159 : vector<8x1xf32> to vector<8x8xf32>
    %161 = arith.subf %157, %160 : vector<8x8xf32>
    %162 = math.exp %161 : vector<8x8xf32>
    %cst_64 = arith.constant dense<0.000000e+00> : vector<8xf32>
    %163 = vector.multi_reduction <add>, %162, %cst_64 [1] : vector<8x8xf32> to vector<8xf32>
    %164 = vector.shape_cast %163 : vector<8xf32> to vector<8x1xf32>
    %165 = tpu.reciprocal %164 {approx = true} : vector<8x1xf32> -> vector<8x1xf32>
    %166 = vector.broadcast %165 : vector<8x1xf32> to vector<8x8xf32>
    %167 = arith.mulf %162, %166 : vector<8x8xf32>
    %168 = arith.truncf %167 : vector<8x8xf32> to vector<8x8xbf16>
    %cst_65 = arith.constant dense<0.000000e+00> : vector<8x8xf32>
    %169 = tpu.matmul %168, %155, %cst_65 {dimension_numbers = #tpu.dot_dimension_numbers<[1], [0], [0], [1], [0, 0, 1, 1], [], []>} : vector<8x8xbf16>, vector<8x8xbf16>, vector<8x8xf32> -> vector<8x8xf32>
    %170 = arith.truncf %169 : vector<8x8xf32> to vector<8x8xbf16>
    %c8_66 = arith.constant 8 : index
    %c0_67 = arith.constant 0 : index
    %171 = vector.load %arg14[%c8_66, %c0_67] : memref<32x32xbf16, #tpu.memory_space<vmem>>, vector<8x32xbf16>
    %cst_68 = arith.constant dense<0.000000e+00> : vector<8x32xf32>
    %172 = tpu.matmul %170, %171, %cst_68 {dimension_numbers = #tpu.dot_dimension_numbers<[1], [0], [0], [1], [0, 0, 1, 1], [], []>} : vector<8x8xbf16>, vector<8x32xbf16>, vector<8x32xf32> -> vector<8x32xf32>
    %173 = arith.addf %152, %172 : vector<8x32xf32>
    %174 = vector.extract_strided_slice %126 {offsets = [0, 16], sizes = [8, 8], strides = [1, 1]} : vector<8x32xbf16> to vector<8x8xbf16>
    %175 = vector.extract_strided_slice %128 {offsets = [0, 16], sizes = [8, 8], strides = [1, 1]} : vector<8x32xbf16> to vector<8x8xbf16>
    %176 = vector.extract_strided_slice %130 {offsets = [0, 16], sizes = [8, 8], strides = [1, 1]} : vector<8x32xbf16> to vector<8x8xbf16>
    %177 = tpu.transpose %175, [1, 0] : vector<8x8xbf16> -> vector<8x8xbf16>
    %cst_69 = arith.constant dense<0.000000e+00> : vector<8x8xf32>
    %178 = tpu.matmul %174, %177, %cst_69 {dimension_numbers = #tpu.dot_dimension_numbers<[1], [0], [0], [1], [0, 0, 1, 1], [], []>} : vector<8x8xbf16>, vector<8x8xbf16>, vector<8x8xf32> -> vector<8x8xf32>
    %cst_70 = arith.constant dense<0xFF800000> : vector<8xf32>
    %179 = vector.multi_reduction <maximumf>, %178, %cst_70 [1] : vector<8x8xf32> to vector<8xf32>
    %180 = vector.shape_cast %179 : vector<8xf32> to vector<8x1xf32>
    %181 = vector.broadcast %180 : vector<8x1xf32> to vector<8x8xf32>
    %182 = arith.subf %178, %181 : vector<8x8xf32>
    %183 = math.exp %182 : vector<8x8xf32>
    %cst_71 = arith.constant dense<0.000000e+00> : vector<8xf32>
    %184 = vector.multi_reduction <add>, %183, %cst_71 [1] : vector<8x8xf32> to vector<8xf32>
    %185 = vector.shape_cast %184 : vector<8xf32> to vector<8x1xf32>
    %186 = tpu.reciprocal %185 {approx = true} : vector<8x1xf32> -> vector<8x1xf32>
    %187 = vector.broadcast %186 : vector<8x1xf32> to vector<8x8xf32>
    %188 = arith.mulf %183, %187 : vector<8x8xf32>
    %189 = arith.truncf %188 : vector<8x8xf32> to vector<8x8xbf16>
    %cst_72 = arith.constant dense<0.000000e+00> : vector<8x8xf32>
    %190 = tpu.matmul %189, %176, %cst_72 {dimension_numbers = #tpu.dot_dimension_numbers<[1], [0], [0], [1], [0, 0, 1, 1], [], []>} : vector<8x8xbf16>, vector<8x8xbf16>, vector<8x8xf32> -> vector<8x8xf32>
    %191 = arith.truncf %190 : vector<8x8xf32> to vector<8x8xbf16>
    %c16_73 = arith.constant 16 : index
    %c0_74 = arith.constant 0 : index
    %192 = vector.load %arg14[%c16_73, %c0_74] : memref<32x32xbf16, #tpu.memory_space<vmem>>, vector<8x32xbf16>
    %cst_75 = arith.constant dense<0.000000e+00> : vector<8x32xf32>
    %193 = tpu.matmul %191, %192, %cst_75 {dimension_numbers = #tpu.dot_dimension_numbers<[1], [0], [0], [1], [0, 0, 1, 1], [], []>} : vector<8x8xbf16>, vector<8x32xbf16>, vector<8x32xf32> -> vector<8x32xf32>
    %194 = arith.addf %173, %193 : vector<8x32xf32>
    %195 = vector.extract_strided_slice %126 {offsets = [0, 24], sizes = [8, 8], strides = [1, 1]} : vector<8x32xbf16> to vector<8x8xbf16>
    %196 = vector.extract_strided_slice %128 {offsets = [0, 24], sizes = [8, 8], strides = [1, 1]} : vector<8x32xbf16> to vector<8x8xbf16>
    %197 = vector.extract_strided_slice %130 {offsets = [0, 24], sizes = [8, 8], strides = [1, 1]} : vector<8x32xbf16> to vector<8x8xbf16>
    %198 = tpu.transpose %196, [1, 0] : vector<8x8xbf16> -> vector<8x8xbf16>
    %cst_76 = arith.constant dense<0.000000e+00> : vector<8x8xf32>
    %199 = tpu.matmul %195, %198, %cst_76 {dimension_numbers = #tpu.dot_dimension_numbers<[1], [0], [0], [1], [0, 0, 1, 1], [], []>} : vector<8x8xbf16>, vector<8x8xbf16>, vector<8x8xf32> -> vector<8x8xf32>
    %cst_77 = arith.constant dense<0xFF800000> : vector<8xf32>
    %200 = vector.multi_reduction <maximumf>, %199, %cst_77 [1] : vector<8x8xf32> to vector<8xf32>
    %201 = vector.shape_cast %200 : vector<8xf32> to vector<8x1xf32>
    %202 = vector.broadcast %201 : vector<8x1xf32> to vector<8x8xf32>
    %203 = arith.subf %199, %202 : vector<8x8xf32>
    %204 = math.exp %203 : vector<8x8xf32>
    %cst_78 = arith.constant dense<0.000000e+00> : vector<8xf32>
    %205 = vector.multi_reduction <add>, %204, %cst_78 [1] : vector<8x8xf32> to vector<8xf32>
    %206 = vector.shape_cast %205 : vector<8xf32> to vector<8x1xf32>
    %207 = tpu.reciprocal %206 {approx = true} : vector<8x1xf32> -> vector<8x1xf32>
    %208 = vector.broadcast %207 : vector<8x1xf32> to vector<8x8xf32>
    %209 = arith.mulf %204, %208 : vector<8x8xf32>
    %210 = arith.truncf %209 : vector<8x8xf32> to vector<8x8xbf16>
    %cst_79 = arith.constant dense<0.000000e+00> : vector<8x8xf32>
    %211 = tpu.matmul %210, %197, %cst_79 {dimension_numbers = #tpu.dot_dimension_numbers<[1], [0], [0], [1], [0, 0, 1, 1], [], []>} : vector<8x8xbf16>, vector<8x8xbf16>, vector<8x8xf32> -> vector<8x8xf32>
    %212 = arith.truncf %211 : vector<8x8xf32> to vector<8x8xbf16>
    %c24_80 = arith.constant 24 : index
    %c0_81 = arith.constant 0 : index
    %213 = vector.load %arg14[%c24_80, %c0_81] : memref<32x32xbf16, #tpu.memory_space<vmem>>, vector<8x32xbf16>
    %cst_82 = arith.constant dense<0.000000e+00> : vector<8x32xf32>
    %214 = tpu.matmul %212, %213, %cst_82 {dimension_numbers = #tpu.dot_dimension_numbers<[1], [0], [0], [1], [0, 0, 1, 1], [], []>} : vector<8x8xbf16>, vector<8x32xbf16>, vector<8x32xf32> -> vector<8x32xf32>
    %215 = arith.addf %194, %214 : vector<8x32xf32>
    %c0_83 = arith.constant 0 : index
    %c0_84 = arith.constant 0 : index
    %216 = vector.load %arg15[%c0_83, %c0_84] : memref<1x32xf32, #tpu.memory_space<vmem>>, vector<1x32xf32>
    %217 = vector.broadcast %216 : vector<1x32xf32> to vector<8x32xf32>
    %218 = arith.addf %215, %217 : vector<8x32xf32>
    %219 = arith.truncf %218 : vector<8x32xf32> to vector<8x32xbf16>
    %cst_85 = arith.constant 0.000000e+00 : f32
    %220 = vector.broadcast %cst_85 : f32 to vector<8x32xf32>
    %c0_86 = arith.constant 0 : index
    %c0_87 = arith.constant 0 : index
    %221 = vector.load %arg16[%c0_86, %c0_87] : memref<32x128xbf16, #tpu.memory_space<vmem>>, vector<32x128xbf16>
    %cst_88 = arith.constant dense<0.000000e+00> : vector<8x128xf32>
    %222 = tpu.matmul %219, %221, %cst_88 {dimension_numbers = #tpu.dot_dimension_numbers<[1], [0], [0], [1], [0, 0, 1, 1], [], []>} : vector<8x32xbf16>, vector<32x128xbf16>, vector<8x128xf32> -> vector<8x128xf32>
    %c0_89 = arith.constant 0 : index
    %c0_90 = arith.constant 0 : index
    %223 = vector.load %arg17[%c0_89, %c0_90] : memref<1x128xf32, #tpu.memory_space<vmem>>, vector<1x128xf32>
    %224 = vector.broadcast %223 : vector<1x128xf32> to vector<8x128xf32>
    %225 = arith.addf %222, %224 : vector<8x128xf32>
    %cst_91 = arith.constant 5.000000e-01 : f32
    %226 = vector.broadcast %cst_91 : f32 to vector<8x128xf32>
    %227 = arith.mulf %226, %225 : vector<8x128xf32>
    %cst_92 = arith.constant 4.471500e-02 : f32
    %228 = vector.broadcast %cst_92 : f32 to vector<8x128xf32>
    %229 = arith.mulf %228, %225 : vector<8x128xf32>
    %230 = arith.mulf %229, %225 : vector<8x128xf32>
    %231 = arith.mulf %230, %225 : vector<8x128xf32>
    %232 = arith.addf %225, %231 : vector<8x128xf32>
    %cst_93 = arith.constant 0.797884583 : f32
    %233 = vector.broadcast %cst_93 : f32 to vector<8x128xf32>
    %234 = arith.mulf %233, %232 : vector<8x128xf32>
    %235 = math.tanh %234 : vector<8x128xf32>
    %cst_94 = arith.constant 1.000000e+00 : f32
    %236 = vector.broadcast %cst_94 : f32 to vector<8x128xf32>
    %237 = arith.addf %236, %235 : vector<8x128xf32>
    %238 = arith.mulf %227, %237 : vector<8x128xf32>
    %239 = arith.truncf %238 : vector<8x128xf32> to vector<8x128xbf16>
    %c0_95 = arith.constant 0 : index
    %c0_96 = arith.constant 0 : index
    %240 = vector.load %arg18[%c0_95, %c0_96] : memref<128x32xbf16, #tpu.memory_space<vmem>>, vector<128x32xbf16>
    %cst_97 = arith.constant dense<0.000000e+00> : vector<8x32xf32>
    %241 = tpu.matmul %239, %240, %cst_97 {dimension_numbers = #tpu.dot_dimension_numbers<[1], [0], [0], [1], [0, 0, 1, 1], [], []>} : vector<8x128xbf16>, vector<128x32xbf16>, vector<8x32xf32> -> vector<8x32xf32>
    %242 = arith.addf %220, %241 : vector<8x32xf32>
    %c0_98 = arith.constant 0 : index
    %c0_99 = arith.constant 0 : index
    %243 = vector.load %arg19[%c0_98, %c0_99] : memref<1x32xf32, #tpu.memory_space<vmem>>, vector<1x32xf32>
    %244 = vector.broadcast %243 : vector<1x32xf32> to vector<8x32xf32>
    %245 = arith.addf %242, %244 : vector<8x32xf32>
    %c0_100 = arith.constant 0 : index
    %c0_101 = arith.constant 0 : index
    %c0_102 = arith.constant 0 : index
    %246 = vector.load %arg20[%c0_100, %c0_101, %c0_102] : memref<1x8x32xf32, #tpu.memory_space<vmem>>, vector<1x8x32xf32>
    %247 = vector.shape_cast %246 : vector<1x8x32xf32> to vector<8x32xf32>
    %248 = vector.shape_cast %245 : vector<8x32xf32> to vector<1x8x32xf32>
    tpu.vector_store %arg20[%c0_100, %c0_101, %c0_102], %248 {strides = array<i32>} : memref<1x8x32xf32, #tpu.memory_space<vmem>>, vector<1x8x32xf32>,
    return
  }
  func.func @transform_0(%arg0: i32, %arg1: i32) -> (i32, i32, i32) {
    %c0_i32 = arith.constant 0 : i32
    %c0_i32_0 = arith.constant 0 : i32
    %c0_i32_1 = arith.constant 0 : i32
    return %arg0, %c0_i32, %c0_i32_0 : i32, i32, i32
  }
  func.func @transform_1(%arg0: i32, %arg1: i32) -> (i32, i32, i32) {
    %c0_i32 = arith.constant 0 : i32
    %c0_i32_0 = arith.constant 0 : i32
    %c0_i32_1 = arith.constant 0 : i32
    return %arg0, %c0_i32, %c0_i32_0 : i32, i32, i32
  }
  func.func @transform_2(%arg0: i32, %arg1: i32) -> (i32, i32) {
    %c0_i32 = arith.constant 0 : i32
    %c0_i32_0 = arith.constant 0 : i32
    %c0_i32_1 = arith.constant 0 : i32
    return %c0_i32, %c0_i32_0 : i32, i32
  }
  func.func @transform_3(%arg0: i32, %arg1: i32) -> (i32, i32) {
    %c0_i32 = arith.constant 0 : i32
    %c0_i32_0 = arith.constant 0 : i32
    %c0_i32_1 = arith.constant 0 : i32
    return %c0_i32, %c0_i32_0 : i32, i32
  }
  func.func @transform_4(%arg0: i32, %arg1: i32) -> (i32, i32) {
    %c0_i32 = arith.constant 0 : i32
    %c0_i32_0 = arith.constant 0 : i32
    %c0_i32_1 = arith.constant 0 : i32
    return %c0_i32, %c0_i32_0 : i32, i32
  }
  func.func @transform_5(%arg0: i32, %arg1: i32) -> (i32, i32) {
    %c0_i32 = arith.constant 0 : i32
    %c0_i32_0 = arith.constant 0 : i32
    %c0_i32_1 = arith.constant 0 : i32
    return %c0_i32, %c0_i32_0 : i32, i32
  }
  func.func @transform_6(%arg0: i32, %arg1: i32) -> (i32, i32) {
    %c0_i32 = arith.constant 0 : i32
    %c0_i32_0 = arith.constant 0 : i32
    %c0_i32_1 = arith.constant 0 : i32
    return %c0_i32, %c0_i32_0 : i32, i32
  }
  func.func @transform_7(%arg0: i32, %arg1: i32) -> (i32, i32) {
    %c0_i32 = arith.constant 0 : i32
    %c0_i32_0 = arith.constant 0 : i32
    %c0_i32_1 = arith.constant 0 : i32
    return %c0_i32, %c0_i32_0 : i32, i32
  }
  func.func @transform_8(%arg0: i32, %arg1: i32) -> (i32, i32) {
    %c0_i32 = arith.constant 0 : i32
    %c0_i32_0 = arith.constant 0 : i32
    %c0_i32_1 = arith.constant 0 : i32
    return %c0_i32, %c0_i32_0 : i32, i32
  }
  func.func @transform_9(%arg0: i32, %arg1: i32) -> (i32, i32) {
    %c0_i32 = arith.constant 0 : i32
    %c0_i32_0 = arith.constant 0 : i32
    %c0_i32_1 = arith.constant 0 : i32
    return %c0_i32, %c0_i32_0 : i32, i32
  }
  func.func @transform_10(%arg0: i32, %arg1: i32) -> (i32, i32) {
    %c0_i32 = arith.constant 0 : i32
    %c0_i32_0 = arith.constant 0 : i32
    %c0_i32_1 = arith.constant 0 : i32
    return %c0_i32, %c0_i32_0 : i32, i32
  }
  func.func @transform_11(%arg0: i32, %arg1: i32) -> (i32, i32) {
    %c0_i32 = arith.constant 0 : i32
    %c0_i32_0 = arith.constant 0 : i32
    %c0_i32_1 = arith.constant 0 : i32
    return %c0_i32, %c0_i32_0 : i32, i32
  }
  func.func @transform_12(%arg0: i32, %arg1: i32) -> (i32, i32) {
    %c0_i32 = arith.constant 0 : i32
    %c0_i32_0 = arith.constant 0 : i32
    %c0_i32_1 = arith.constant 0 : i32
    return %c0_i32, %c0_i32_0 : i32, i32
  }
  func.func @transform_13(%arg0: i32, %arg1: i32) -> (i32, i32) {
    %c0_i32 = arith.constant 0 : i32
    %c0_i32_0 = arith.constant 0 : i32
    %c0_i32_1 = arith.constant 0 : i32
    return %c0_i32, %c0_i32_0 : i32, i32
  }
  func.func @transform_14(%arg0: i32, %arg1: i32) -> (i32, i32) {
    %c0_i32 = arith.constant 0 : i32
    %c0_i32_0 = arith.constant 0 : i32
    %c0_i32_1 = arith.constant 0 : i32
    return %c0_i32, %c0_i32_0 : i32, i32
  }
  func.func @transform_15(%arg0: i32, %arg1: i32) -> (i32, i32) {
    %c0_i32 = arith.constant 0 : i32
    %c0_i32_0 = arith.constant 0 : i32
    %c0_i32_1 = arith.constant 0 : i32
    return %c0_i32, %c0_i32_0 : i32, i32
  }
  func.func @transform_16(%arg0: i32, %arg1: i32) -> (i32, i32) {
    %c0_i32 = arith.constant 0 : i32
    %c0_i32_0 = arith.constant 0 : i32
    %c0_i32_1 = arith.constant 0 : i32
    return %c0_i32, %c0_i32_0 : i32, i32
  }
  func.func @transform_17(%arg0: i32, %arg1: i32) -> (i32, i32) {
    %c0_i32 = arith.constant 0 : i32
    %c0_i32_0 = arith.constant 0 : i32
    %c0_i32_1 = arith.constant 0 : i32
    return %c0_i32, %c0_i32_0 : i32, i32
  }
  func.func @transform_18(%arg0: i32, %arg1: i32) -> (i32, i32, i32) {
    %c0_i32 = arith.constant 0 : i32
    %c0_i32_0 = arith.constant 0 : i32
    return %arg0, %arg1, %c0_i32 : i32, i32, i32
  }
}

</mosaic_0001>

<bundles_post_ra>
// kernel: tpu_custom_call.1
= control target key start
LH: loop header
LB: loop body
LE: loop exit
PB: predicated region body
PF: predicated region fallthrough
CT: control target
= control target key end

     0   :  { %s4178_s0 = inlined_call_operand.vmem [shape: f32[2,8,32], index: 0, kind: input, shape index: {}]   ;;  %s4179_s1 = inlined_call_operand.vmem [shape: f32[2,8,32], index: 1, kind: input, shape index: {}]   ;;  %s4180_s2 = inlined_call_operand.vmem [shape: bf16[32,32], index: 2, kind: input, shape index: {}]   ;;  %s4181_s3 = inlined_call_operand.vmem [shape: f32[1,32], index: 3, kind: input, shape index: {}]   ;;  %s4182_s4 = inlined_call_operand.vmem [shape: bf16[32,64], index: 4, kind: input, shape index: {}]   ;;  %s4183_s5 = inlined_call_operand.hbm [shape: f32[1,64], index: 5, kind: input, shape index: {}]   ;;  %s4184_s6 = inlined_call_operand.vmem [shape: bf16[32,32], index: 6, kind: input, shape index: {}]   ;;  %s4185_s7 = inlined_call_operand.hbm [shape: f32[1,32], index: 7, kind: input, shape index: {}]   ;;  %s4186_s8 = inlined_call_operand.hbm [shape: bf16[32,32], index: 8, kind: input, shape index: {}]   ;;  %s4187_s9 = inlined_call_operand.hbm [shape: f32[1,32], index: 9, kind: input, shape index: {}]   ;;  %s4188_s10 = inlined_call_operand.vmem [shape: bf16[32,64], index: 10, kind: input, shape index: {}]   ;;  %s4189_s11 = inlined_call_operand.hbm [shape: f32[1,64], index: 11, kind: input, shape index: {}]   ;;  %s4190_s12 = inlined_call_operand.hbm [shape: bf16[32,32], index: 12, kind: input, shape index: {}]   ;;  %s4191_s13 = inlined_call_operand.hbm [shape: f32[1,32], index: 13, kind: input, shape index: {}]   ;;  %s4192_s14 = inlined_call_operand.vmem [shape: bf16[32,128], index: 14, kind: input, shape index: {}]   ;;  %s4193_s15 = inlined_call_operand.vmem [shape: f32[1,128], index: 15, kind: input, shape index: {}]   ;;  %s4194_s16 = inlined_call_operand.vmem [shape: bf16[128,32], index: 16, kind: input, shape index: {}]   ;;  %s4195_s17 = inlined_call_operand.vmem [shape: f32[1,32], index: 17, kind: input, shape index: {}]   ;;  %s4196_s18 = inlined_call_operand.hbm [shape: f32[2,8,32], index: 18, kind: output, shape index: {}]  }
   0x1   :  { %4213 = sst [smem:[#allocation29_spill]] %s4178_s0 }
   0x2   :  { %4214 = sst [smem:[#allocation30_spill]] %s4179_s1 }
   0x3   :  { %4215 = sst [smem:[#allocation31_spill]] %s4180_s2 }
   0x4   :  { %4216 = sst [smem:[#allocation32_spill]] %s4185_s7 }
   0x5   :  { %4217 = sst [smem:[#allocation33_spill]] %s4187_s9 }
   0x6   :  { %4218 = sst [smem:[#allocation34_spill]] %s4195_s17 }
   0x7   :  { %4219 = sst [smem:[#allocation35_spill]] %s4196_s18 }
   0x8   :  { %23 = vsyncpa [#allocation3], 0 }
   0x9   :  { %24 = vsyncpa [#allocation6], 0 }
   0xa   :  { %25 = vsyncpa [#allocation9], 0 }
   0xb   :  { %26 = vsyncpa [#allocation12], 0 }
   0xc   :  { %27 = vsyncpa [#allocation4], 0 }
   0xd   :  { %29 = vsyncpa [#allocation4 + $0x1], 0  ;;  %s3562_s27 = smov 0   ;;  %s3564_s28 = smov 0  }
   0xe   :  { %s3566_s29 = smov 0   ;;  %s3568_s30 = smov 0  }
   0xf   :  { %s3570_s0 = smov 0   ;;  %s3572_s19 = smov 0  }
  0x10 LB: > { %4220 = sst [smem:[#allocation20_spill]] %s3426_s27  ;;  %s2610_s1 = sadd.s32 4294967295, %s3446_s19   ;;  %s3446_s19 = sphi %s3572_s19, %s35_s19   ;;  %s3442_s0 = sphi %s3570_s0, %s4256_s0   ;;  %s3438_s30 = sphi %s3568_s30, %s4255_s30   ;;  %s3434_s29 = sphi %s3566_s29, %s4254_s29   ;;  %s3430_s28 = sphi %s3564_s28, %s4253_s28   ;;  %s3426_s27 = sphi %s3562_s27, %s4252_s27  }
  0x11   : > { %4221 = sst [smem:[#allocation21_spill]] %s3430_s28  ;;  %s2611_s20 = sadd.s32 4294967294, %s3446_s19  }
  0x12   : > { %4222 = sst [smem:[#allocation22_spill]] %s3434_s29  ;;  %s47_s21 = sadd.s32 1, %s3442_s0 }
  0x13   : > { %4223 = sst [smem:[#allocation23_spill]] %s3442_s0  ;;  %s444_s22 = sadd.s32 1, %s3434_s29 }
  0x14   : > { %4224 = sst [smem:[#allocation24_spill]] %s3446_s19  ;;  %p49_p0 = scmp.ge.s32.totalorder %s47_s21, 2 }
  0x15   : > { %p454_p1 = scmp.ne.s32.totalorder %s3434_s29, %s3430_s28  ;;  %p455_p2 = scmp.eq.s32.totalorder %s2610_s1, 1 }
  0x16   : > { %p460_p3 = scmp.ne.s32.totalorder %s3430_s28, %s3426_s27  ;;  %s4258_s21 = smov (%p49_p0, %s47_s21), 0 }
  0x17   : > { %4225 = sst [smem:[#allocation25_spill]] %s4258_s21  ;;  %p3602_p4 = por %p455_p2, %p454_p1 }
  0x18   : > { %p461_p5 = scmp.eq.s32.totalorder %s2611_s20, 1  ;;  %s439_s23 = ssub.s32 %s3442_s0, %s4258_s21 }
  0x19   : > { %s4226_s2 = scalar_select %p3602_p4, 1, 0 }
  0x1a   : > { %p2612_p6 = scmp.ge.s32.totalorder %s3446_s19, 1  ;;  %p442_p7 = scmp.eq.s32.totalorder %s439_s23, 0 }
  0x1b   : > { %4227 = sst [smem:[#allocation26_spill]] %s4226_s2  ;;  %p3609_p8 = por %p461_p5, %p460_p3 }
  0x1c   : > { %p468_p9 = scmp.lt.s32.totalorder %s3446_s19, 3  ;;  %p3621_p11 = scmp.eq.s32.totalorder %s2610_s1, 0 }
  0x1d   : > { %s4228_s24 = scalar_select %p3609_p8, 1, 0 }
  0x1e   : > { %s3615_s25 = scalar_select %p442_p7, %s3434_s29, %s444_s22  }
  0x1f   : > { %4229 = sst [smem:[#allocation27_spill]] %s4228_s24  ;;  %p3617_p10 = pnand %p2612_p6, %p468_p9 }
  0x20   : > { %4230 = sst [smem:[#allocation28_spill]] %s3615_s25  ;;  %s3448_s20 = smov [#allocation5]  }
  0x21   : > { %s4231_s26 = scalar_select %p3617_p10, 1, 0 }
  0x22   : > { %s4232_s27 = scalar_select %p3621_p11, 1, 0 }
  0x23   : > { %p2997_p12 = pneg %p3617_p10  ;;  %s504_s23 = sshll.u32 %s3448_s20, 4  ;;  %s505_s23 = int_to_ptr.vmem [resolvable:$true] %s504_s23 }
  0x24   : > { %s3449_s21 = smov [#allocation8]   ;;  %s4234_s7 = sld [smem:[#allocation32_spill]] }
  0x25   : > { %s528_s0 = sshll.u32 %s3449_s21, 4  ;;  %p3629_p13 = pnand %p3621_p11, %p2997_p12  ;;  %s3633_s0 = int_to_ptr.vmem [resolvable:$true] %s528_s0 }
  0x27   : > { %p3643_p1 = pneg %p3629_p13 }
  0x2a   : > { %s3156_s29 = scalar_lea.hbm %s4234_s7, 16 }
  0x2b   : > { %p3157_p0 = scmp.ne.s32.totalorder %s4234_s7, %s3156_s29  ;;  %p3163_p5 = scmp.lt.u32.totalorder %s3156_s29, %s4234_s7 }
  0x2d   : > { %p3159_p2 = pnand %p3643_p1, %p3157_p0 }
  0x2f   : > { %p3160_p3 = pneg %p3159_p2 }
  0x31   : > { %p3165_p6 = pnand %p3163_p5, %p3160_p3 }
  0x33   : > { %3168 = shalt.err (!%p3165_p6)
}
  0x34   : > { %s3169_s25 = scalar_lea.vmem %s505_s23, 16  ;;  %s3176_s19 = scalar_lea.vmem %s505_s23, 32 }
  0x35   : > { %p3170_p7 = scmp.ne.s32.totalorder %s505_s23, %s3169_s25  ;;  %p3177_p8 = scmp.lt.s32.totalorder %s505_s23, %s505_s23 }
  0x36   : > { %p3178_p4 = scmp.lt.s32.totalorder %s3176_s19, %s3169_s25 }
  0x37   : > { %p3172_p9 = pnand %p3170_p7, %p3643_p1 }
  0x38   : > { %p3179_p11 = por %p3178_p4, %p3177_p8 }
  0x39   : > { %p3173_p12 = pneg %p3172_p9 }
  0x3b   : > { %p3180_p10 = pnand %p3179_p11, %p3173_p12 }
  0x3d   : > { %3183 = shalt.err (!%p3180_p10)
}
  0x3e   : > { %3003 = dma.hbm_to_vmem [thread:$0]  (!%p3629_p13), %s4234_s7, 16, %s505_s23, [#allocation6]  }
  0x3f   : > { %s4236_s9 = sld [smem:[#allocation33_spill]] }
  0x45   : > { %s3184_s21 = scalar_lea.hbm %s4236_s9, 16 }
  0x46   : > { %p3185_p0 = scmp.ne.s32.totalorder %s4236_s9, %s3184_s21  ;;  %p3191_p8 = scmp.lt.u32.totalorder %s3184_s21, %s4236_s9 }
  0x48   : > { %p3187_p2 = pnand %p3185_p0, %p3643_p1 }
  0x4a   : > { %p3188_p4 = pneg %p3187_p2 }
  0x4c   : > { %p3193_p10 = pnand %p3191_p8, %p3188_p4 }
  0x4e   : > { %3196 = shalt.err (!%p3193_p10)
}
  0x4f   : > { %s3197_s23 = scalar_lea.vmem %s3633_s0, 16  ;;  %s3204_s17 = scalar_lea.vmem %s3633_s0, 32 }
  0x50   : > { %p3198_p11 = scmp.ne.s32.totalorder %s3633_s0, %s3197_s23  ;;  %p3205_p6 = scmp.lt.s32.totalorder %s3633_s0, %s3633_s0 }
  0x51   : > { %p3206_p7 = scmp.lt.s32.totalorder %s3204_s17, %s3197_s23 }
  0x52   : > { %p3200_p3 = pnand %p3198_p11, %p3643_p1 }
  0x53   : > { %p3207_p9 = por %p3206_p7, %p3205_p6 }
  0x54   : > { %p3201_p5 = pneg %p3200_p3 }
  0x56   : > { %p3208_p12 = pnand %p3207_p9, %p3201_p5 }
  0x58   : > { %3211 = shalt.err (!%p3208_p12)
}
  0x59   : > { %3009 = dma.hbm_to_vmem [thread:$0]  (!%p3629_p13), %s4236_s9, 16, %s3633_s0, [#allocation9]  }
  0x5a   : > { %s3450_s1 = smov [#allocation11]   ;;  %s3212_s25 = scalar_lea.hbm %s4190_s12, 256 }
  0x5b   : > { %s552_s18 = sshll.u32 %s3450_s1, 4  ;;  %p3213_p0 = scmp.ne.s32.totalorder %s4190_s12, %s3212_s25  ;;  %s553_s18 = int_to_ptr.vmem [resolvable:$true] %s552_s18 }
  0x5c   : > { %p3219_p8 = scmp.lt.u32.totalorder %s3212_s25, %s4190_s12 }
  0x5d   : > { %p3215_p2 = pnand %p3213_p0, %p3643_p1 }
  0x5f   : > { %p3216_p4 = pneg %p3215_p2 }
  0x61   : > { %p3221_p10 = pnand %p3219_p8, %p3216_p4 }
  0x63   : > { %3224 = shalt.err (!%p3221_p10)
}
  0x64   : > { %s3225_s0 = scalar_lea.vmem %s553_s18, 256  ;;  %p3233_p6 = scmp.lt.s32.totalorder %s553_s18, %s553_s18 }
  0x65   : > { %p3226_p11 = scmp.ne.s32.totalorder %s553_s18, %s3225_s0  ;;  %p3234_p7 = scmp.lt.s32.totalorder %s3225_s0, %s3225_s0 }
  0x67   : > { %p3228_p3 = pnand %p3226_p11, %p3643_p1  ;;  %p3235_p9 = por %p3234_p7, %p3233_p6 }
  0x69   : > { %p3229_p5 = pneg %p3228_p3 }
  0x6b   : > { %p3236_p12 = pnand %p3235_p9, %p3229_p5 }
  0x6d   : > { %3239 = shalt.err (!%p3236_p12)
}
  0x6e   : > { %s3451_s2 = smov 64   ;;  %s3452_s24 = smov 4  }
  0x6f   : > { %3015 = dma.hbm_to_vmem [thread:$0]  (!%p3629_p13), %s4190_s12, 256, %s553_s18, [#allocation12], %s3451_s2, %s3451_s2, %s3452_s24  }
  0x70   : > { %s3453_s29 = smov [#allocation2]   ;;  %s3454_s25 = smov [#allocation7]  }
  0x71   : > { %s490_s21 = sshll.u32 %s3453_s29, 4  ;;  %s514_s19 = sshll.u32 %s3454_s25, 4  ;;  %s491_s21 = int_to_ptr.vmem [resolvable:$true] %s490_s21  ;;  %s3704_s19 = int_to_ptr.vmem [resolvable:$true] %s514_s19 }
  0x72   : > { %s3240_s0 = scalar_lea.hbm %s4183_s5, 16 }
  0x73   : > { %p3241_p0 = scmp.ne.s32.totalorder %s4183_s5, %s3240_s0  ;;  %p3247_p8 = scmp.lt.u32.totalorder %s3240_s0, %s4183_s5 }
  0x75   : > { %p3243_p2 = pnand %p3241_p0, %p3643_p1 }
  0x77   : > { %p3244_p4 = pneg %p3243_p2 }
  0x79   : > { %p3249_p10 = pnand %p3247_p8, %p3244_p4 }
  0x7b   : > { %3252 = shalt.err (!%p3249_p10)
}
  0x7c   : > { %s3253_s1 = scalar_lea.vmem %s491_s21, 16  ;;  %s3260_s29 = scalar_lea.vmem %s491_s21, 32 }
  0x7d   : > { %p3254_p11 = scmp.ne.s32.totalorder %s491_s21, %s3253_s1  ;;  %p3261_p6 = scmp.lt.s32.totalorder %s491_s21, %s491_s21 }
  0x7e   : > { %p3262_p7 = scmp.lt.s32.totalorder %s3260_s29, %s3253_s1 }
  0x7f   : > { %p3256_p3 = pnand %p3254_p11, %p3643_p1 }
  0x80   : > { %p3263_p9 = por %p3262_p7, %p3261_p6 }
  0x81   : > { %p3257_p5 = pneg %p3256_p3 }
  0x83   : > { %p3264_p12 = pnand %p3263_p9, %p3257_p5 }
  0x85   : > { %3267 = shalt.err (!%p3264_p12)
}
  0x86   : > { %3000 = dma.hbm_to_vmem [thread:$0]  (!%p3629_p13), %s4183_s5, 16, %s491_s21, [#allocation3]  }
  0x87   : > { %s3268_s17 = scalar_lea.hbm %s4186_s8, 256 }
  0x88   : > { %p3269_p0 = scmp.ne.s32.totalorder %s4186_s8, %s3268_s17  ;;  %p3275_p8 = scmp.lt.u32.totalorder %s3268_s17, %s4186_s8 }
  0x8a   : > { %p3271_p2 = pnand %p3269_p0, %p3643_p1 }
  0x8c   : > { %p3272_p4 = pneg %p3271_p2 }
  0x8e   : > { %p3277_p10 = pnand %p3275_p8, %p3272_p4 }
  0x90   : > { %3280 = shalt.err (!%p3277_p10)
}
  0x91   : > { %s3281_s21 = scalar_lea.vmem %s3704_s19, 256  ;;  %p3289_p6 = scmp.lt.s32.totalorder %s3704_s19, %s3704_s19 }
  0x92   : > { %p3282_p11 = scmp.ne.s32.totalorder %s3704_s19, %s3281_s21  ;;  %p3290_p7 = scmp.lt.s32.totalorder %s3281_s21, %s3281_s21 }
  0x94   : > { %p3284_p3 = pnand %p3282_p11, %p3643_p1  ;;  %p3291_p9 = por %p3290_p7, %p3289_p6 }
  0x96   : > { %p3285_p5 = pneg %p3284_p3 }
  0x98   : > { %p3292_p12 = pnand %p3291_p9, %p3285_p5 }
  0x9a   : > { %3295 = shalt.err (!%p3292_p12)
}
  0x9b   : > { %3006 = dma.hbm_to_vmem [thread:$0]  (!%p3629_p13), %s4186_s8, 256, %s3704_s19, [#allocation6], %s3451_s2, %s3451_s2, %s3452_s24  }
  0x9c   : > { %s3455_s28 = smov [#allocation10]   ;;  %s3456_s23 = smov [#allocation13]  }
  0x9d   : > { %s542_s25 = sshll.u32 %s3455_s28, 4  ;;  %s566_s17 = sshll.u32 %s3456_s23, 4  ;;  %s543_s25 = int_to_ptr.vmem [resolvable:$true] %s542_s25  ;;  %s3750_s17 = int_to_ptr.vmem [resolvable:$true] %s566_s17 }
  0x9e   : > { %s3296_s18 = scalar_lea.hbm %s4189_s11, 16 }
  0x9f   : > { %p3297_p0 = scmp.ne.s32.totalorder %s4189_s11, %s3296_s18  ;;  %p3303_p8 = scmp.lt.u32.totalorder %s3296_s18, %s4189_s11 }
  0xa1   : > { %p3299_p2 = pnand %p3297_p0, %p3643_p1 }
  0xa3   : > { %p3300_p4 = pneg %p3299_p2 }
  0xa5   : > { %p3305_p10 = pnand %p3303_p8, %p3300_p4 }
  0xa7   : > { %3308 = shalt.err (!%p3305_p10)
}
  0xa8   : > { %s3309_s24 = scalar_lea.vmem %s543_s25, 16  ;;  %s3316_s19 = scalar_lea.vmem %s543_s25, 32 }
  0xa9   : > { %p3310_p11 = scmp.ne.s32.totalorder %s543_s25, %s3309_s24  ;;  %p3317_p6 = scmp.lt.s32.totalorder %s543_s25, %s543_s25 }
  0xaa   : > { %p3318_p7 = scmp.lt.s32.totalorder %s3316_s19, %s3309_s24 }
  0xab   : > { %p3312_p3 = pnand %p3310_p11, %p3643_p1 }
  0xac   : > { %p3319_p9 = por %p3318_p7, %p3317_p6 }
  0xad   : > { %p3313_p5 = pneg %p3312_p3 }
  0xaf   : > { %p3320_p12 = pnand %p3319_p9, %p3313_p5 }
  0xb1   : > { %3323 = shalt.err (!%p3320_p12)
}
  0xb2   : > { %3012 = dma.hbm_to_vmem [thread:$0]  (!%p3629_p13), %s4189_s11, 16, %s543_s25, [#allocation9]  }
  0xb3   : > { %s3324_s7 = scalar_lea.hbm %s4191_s13, 16 }
  0xb4   : > { %p3325_p0 = scmp.ne.s32.totalorder %s4191_s13, %s3324_s7  ;;  %p3331_p8 = scmp.lt.u32.totalorder %s3324_s7, %s4191_s13 }
  0xb6   : > { %p3327_p2 = pnand %p3325_p0, %p3643_p1 }
  0xb8   : > { %p3328_p4 = pneg %p3327_p2 }
  0xba   : > { %p3333_p10 = pnand %p3331_p8, %p3328_p4 }
  0xbc   : > { %3336 = shalt.err (!%p3333_p10)
}
  0xbd   : > { %s3337_s25 = scalar_lea.vmem %s3750_s17, 16  ;;  %s3344_s2 = scalar_lea.vmem %s3750_s17, 32 }
  0xbe   : > { %p3338_p11 = scmp.ne.s32.totalorder %s3750_s17, %s3337_s25  ;;  %p3345_p6 = scmp.lt.s32.totalorder %s3750_s17, %s3750_s17 }
  0xbf   : > { %p3346_p7 = scmp.lt.s32.totalorder %s3344_s2, %s3337_s25 }
  0xc0   : > { %p3340_p3 = pnand %p3338_p11, %p3643_p1 }
  0xc1   : > { %p3347_p9 = por %p3346_p7, %p3345_p6 }
  0xc2   : > { %p3341_p5 = pneg %p3340_p3 }
  0xc4   : > { %p3348_p12 = pnand %p3347_p9, %p3341_p5 }
  0xc6   : > { %3351 = shalt.err (!%p3348_p12)
}
  0xc7   : > { %3018 = dma.hbm_to_vmem [thread:$0]  (!%p3629_p13), %s4191_s13, 16, %s3750_s17, [#allocation12]  }
  0xc8   : > { %p4237_p0 = scmp.ne.s32.totalorder %s4231_s26, 0 }
  0xc9   : > { %p4238_p1 = scmp.ne.s32.totalorder (!%p4237_p0), %s4232_s27, 0 }
  0xca   : > { %605 = sbr.rel (%p4237_p0) target bundleno = 5870 (0x16ee), region = 92 }
  0xd1   : > { %3405 = dma.done.wait (%p4238_p1), [#allocation3], 16  }
  0xd2   : > { %3407 = vsyncadd (%p4238_p1), [#allocation3], 4294967280 }
  0xd3   : > { %3409 = dma.done.wait (%p4238_p1), [#allocation6], 272  }
  0xd4   : > { %3411 = vsyncadd (%p4238_p1), [#allocation6], 4294967024 }
  0xd5   : > { %3413 = dma.done.wait (%p4238_p1), [#allocation9], 32  }
  0xd6   : > { %3415 = vsyncadd (%p4238_p1), [#allocation9], 4294967264 }
  0xd7   : > { %3417 = dma.done.wait (%p4238_p1), [#allocation12], 272  }
  0xd8   : > { %3419 = vsyncadd (%p4238_p1), [#allocation12], 4294967024  ;;  %p686_p13 = scmp.lt.s32.totalorder %s3438_s30, 1  ;;  %v3457_v0 = vmov 0.0   ;;  %vm3458_vm0 = vmmov 0   ;;  %s4239_s17 = sld [smem:[#allocation29_spill]] }
  0xd9   : > { %2763 = vmatprep.subr.bf16.mxu0 %v3457_v0  ;;  %2767 = vmatprep.mubr.msk.bf16.mxu0 %vm3458_vm0, %v3457_v0  ;;  %s4240_s0 = sld [smem:[#allocation31_spill]]  ;;  %vm724_vm1 = vcmask 261120   ;;  %v3106_v4 = vld [vmem:[%s4182_s4] sm:$0xff]   ;;  %v3107_v6 = vld [vmem:[%s4182_s4 + $0x8] sm:$0xff]   ;;  %vm837_vm2 = vcmask 64512   ;;  %s3459_s22 = smov 120  }
  0xda   : > { %s3817_s26 = scalar_select %p686_p13, %s3438_s30, 1  ;;  %2785 = vmatprep.subr.bf16.mxu1 %v3457_v0  ;;  %2787 = vmatprep.mubr.msk.bf16.mxu1 %vm3458_vm0, %v3457_v0  ;;  %v2636_v11 = vld [vmem:[#allocation2] ss:$0 sm:$0xff]  ;;  %vm902_vm3 = vcmask 1043456   ;;  %v1060_v51 = vld [vmem:[%s4184_s6 + $0x4] sm:$0xf] }
  0xdb   : > { %v2632_v12 = vld [vmem:[%s4181_s3] ss:$0 sm:$0xff]  ;;  %s3460_s20 = smov 96   ;;  %v1065_v52 = vsel %vm902_vm3, %v1060_v51, 0  ;;  %s3463_s1 = smov 80  }
  0xdc   : > { %s2630_s27 = sshll.u32 %s3817_s26, 3  ;;  %v947_v57 = vld [vmem:[%s4184_s6] sm:$0xf]  ;;  %s3464_s21 = smov 104  }
  0xdd   : > { %v1111_v60 = vsel %vm902_vm3, %v947_v57, 0  ;;  %s3465_s2 = smov 72   ;;  %v1423_v57 = vld [vmem:[%s4184_s6 + $0xc] sm:$0xf]  ;;  %s4242_s29 = sld [smem:[#allocation30_spill]] }
  0xde   : > { %s689_s9 = scalar_lea.vmem %s4239_s17, %s2630_s27  ;;  %s3461_s17 = smov 88  }
  0xdf   : > { %s4241_s7 = smov %s4240_s0  ;;  %v3104_v1 = vld [vmem:[%s4240_s0] sm:$0xff]   ;;  %s4244_s23 = sld [smem:[#allocation34_spill]] }
  0xe0   : > { %2764 = vmatpush3.bf16.msra.mxu0 %v3104_v1  ;;  %v3105_v2 = vld [vmem:[%s4241_s7 + $0x8] sm:$0xff]   ;;  %v696_v3 = vld [vmem:[%s689_s9] sm:$0xff]  ;;  %s3462_s9 = smov 112   ;;  %s4245_s0 = sld [smem:[#allocation26_spill]] }
  0xe1   : > { %2765 = vmatprep.subr.bf16.mxu0 %v3457_v0  ;;  %v700_v5 = vpack.c.bf16 %v696_v3, %v696_v3  ;;  %s2688_s18 = sshll.u32 %s3438_s30, 7  ;;  %s4246_s26 = sld [smem:[#allocation35_spill]] }
  0xe3   : > { %s693_s25 = scalar_lea.vmem %s4242_s29, %s2630_s27 }
  0xe4   : > { %2766 = vmatpush3.bf16.msra.mxu0 %v3105_v2 }
  0xe5   : > { %2771 = vmatprep.subr.bf16.mxu0 %v3457_v0 }
  0xe6   : > { %p4247_p4 = scmp.ne.s32.totalorder %s4245_s0, 0 }
  0xe7   : > { %2768 = vmatmul.mubr.msk.bf16.vlgmr.msra.gmra.mrb[0].mxu0 %vm724_vm1, %v700_v5  ;;  %s4130_s27 = scalar_lea.hbm %s4246_s26, %s2688_s18 }
  0xe8   : > { %2772 = vmatpush3.bf16.msra.mxu0 %v3106_v4  ;;  %2775 = vmatprep.mubr.msk.bf16.mxu0 %vm3458_vm0, %v3457_v0 }
  0xe9   : > { %2773 = vmatprep.subr.bf16.mxu0 %v3457_v0 }
  0xec   : > { %2774 = vmatpush3.bf16.msra.mxu0 %v3107_v6 }
  0xed   : > { %2779 = vmatprep.subr.bf16.mxu0 %v3457_v0 }
  0xef   : > { %2776 = vmatmul.mubr.msk.bf16.vlgmr.msra.gmra.mrb[4].mxu0 %vm724_vm1, %v700_v5 }
  0xf0   : > { %2781 = vmatprep.mubr.msk.bf16.mxu0 %vm3458_vm0, %v3457_v0 }
 0x1ba   : > { %v762_v7 = vpop.f32.mrb[0].mxu0 }
 0x1bb   : > { %v2769_v8 = vpop.f32.mrb[1].mxu0  ;;  %v763_v17 = vadd.f32 %v2632_v12, %v762_v7 }
 0x1bc   : > { %v765_v9 = vpop.f32.mrb[2].mxu0 }
 0x1bd   : > { %v2770_v10 = vpop.f32.mrb[3].mxu0  ;;  %v3859_v21 = vpack.c.bf16 %v763_v17, %v763_v17 }
 0x1c2   : > { %v829_v13 = vpop.f32.mrb[4].mxu0 }
 0x1c3   : > { %v830_v14 = vadd.f32 %v2636_v11, %v829_v13  ;;  %v2777_v15 = vpop.f32.mrb[5].mxu0 }
 0x1c4   : > { %v832_v16 = vpop.f32.mrb[6].mxu0 }
 0x1c5   : > { %v3853_v18 = vpack.c.bf16 %v830_v14, %v830_v14  ;;  %v2778_v19 = vpop.f32.mrb[7].mxu0 }
 0x1c7   : > { %951 = vrot.lane.b32.xlu0 %v3853_v18, %s3459_s22  ;;  %v842_v20 = vsel %vm837_vm2, %v3853_v18, 0 }
 0x1c8   : > { %2780 = vmatpush3.bf16.xpose.msra.mxu0 %v842_v20 }
 0x1c9   : > { %2791 = vmatprep.subr.bf16.mxu0 %v3457_v0 }
 0x1cb   : > { %949 = vrot.lane.b32.xlu0 %v3859_v21, %s3459_s22 }
 0x1cf   : > { %2782 = vmatmul.mubr.msk.bf16.vlgmr.msra.gmra.mrb[8].mxu0 %vm837_vm2, %v3859_v21 }
 0x1d0   : > { %2793 = vmatprep.mubr.msk.bf16.mxu0 %vm3458_vm0, %v3457_v0 }
 0x239   : > { %v952_v22 = vpop.permute.xlu0 %951 }
 0x23a   : > { %v957_v23 = vsel %vm837_vm2, %v952_v22, 0 }
 0x23b   : > { %2792 = vmatpush3.bf16.xpose.msra.mxu0 %v957_v23 }
 0x23c   : > { %2803 = vmatprep.subr.bf16.mxu0 %v3457_v0 }
 0x23d   : > { %v950_v24 = vpop.permute.xlu0 %949 }
 0x242   : > { %2794 = vmatmul.mubr.msk.bf16.vlgmr.msra.gmra.mrb[12].mxu0 %vm837_vm2, %v950_v24 }
 0x243   : > { %2805 = vmatprep.mubr.msk.bf16.mxu0 %vm3458_vm0, %v3457_v0  ;;  %2804 = vmatpush3.bf16.msra.mxu0 %v1065_v52 }
 0x244   : > { %2815 = vmatprep.subr.bf16.mxu0 %v3457_v0 }
 0x2a2   : > { %v878_v25 = vpop.f32.mrb[8].mxu0 }
 0x2a3   : > { %v2783_v26 = vpop.f32.mrb[9].mxu0  ;;  %v884_v27 = vsel %vm837_vm2, %v878_v25, -inf }
 0x2a4   : > { %885 = vmax.xlane.f32.xlu1 %v884_v27  ;;  %v881_v28 = vpop.f32.mrb[10].mxu0 }
 0x2a5   : > { %v2784_v29 = vpop.f32.mrb[11].mxu0 }
 0x315   : > { %v993_v30 = vpop.f32.mrb[12].mxu0 }
 0x316   : > { %v2795_v31 = vpop.f32.mrb[13].mxu0  ;;  %v999_v32 = vsel %vm837_vm2, %v993_v30, -inf }
 0x317   : > { %1000 = vmax.xlane.f32.xlu1 %v999_v32  ;;  %v996_v33 = vpop.f32.mrb[14].mxu0 }
 0x318   : > { %v2796_v34 = vpop.f32.mrb[15].mxu0 }
 0x328   : > { %897 = vrot.lane.b32.xlu1 %v3853_v18, %s3460_s20 }
 0x331   : > { %v886_v35 = vpop.xlane.xlu1 %885 }
 0x332   : > { %v887_v36 = vsub.f32 %v878_v25, %v886_v35 }
 0x334   : > { %v888_v37 = vmul.f32 1.442695, %v887_v36 }
 0x336   : > { %3122 = vpow2.f32 %v888_v37 }
 0x340   : > { %v3123_v38 = vpop.eup %3122 }
 0x341   : > { %v890_v39 = vsel %vm837_vm2, %v3123_v38, 0.0 }
 0x342   : > { %891 = vadd.xlane.f32.xlu0 %v890_v39 }
 0x3a4   : > { %v1001_v40 = vpop.xlane.xlu1 %1000 }
 0x3a5   : > { %v1002_v41 = vsub.f32 %v993_v30, %v1001_v40  ;;  %v1264_v40 = vld [vmem:[%s4184_s6 + $0x8] sm:$0xf] }
 0x3a7   : > { %v1003_v42 = vmul.f32 1.442695, %v1002_v41  ;;  %v1269_v41 = vsel %vm902_vm3, %v1264_v40, 0 }
 0x3a8   : > { %v898_v43 = vpop.permute.xlu1 %897 }
 0x3a9   : > { %3124 = vpow2.f32 %v1003_v42  ;;  %v904_v44 = vsel %vm902_vm3, %v898_v43, 0 }
 0x3aa   : > { %2786 = vmatpush3.bf16.msra.mxu1 %v904_v44 }
 0x3ab   : > { %2797 = vmatprep.subr.bf16.mxu1 %v3457_v0 }
 0x3b3   : > { %v3125_v45 = vpop.eup %3124 }
 0x3b4   : > { %v1005_v46 = vsel %vm837_vm2, %v3125_v45, 0.0 }
 0x3b5   : > { %1006 = vadd.xlane.f32.xlu1 %v1005_v46 }
 0x3c6   : > { %1011 = vrot.lane.b32.xlu1 %v3853_v18, %s3461_s17 }
 0x3ca   : > { %1155 = vrot.lane.b32.xlu1 %v3853_v18, %s3462_s9 }
 0x3ce   : > { %1153 = vrot.lane.b32.xlu1 %v3859_v21, %s3462_s9 }
 0x3cf   : > { %v892_v47 = vpop.xlane.xlu0 %891 }
 0x3d0   : > { %3126 = vrcp.f32 %v892_v47 }
 0x3da   : > { %v3127_v48 = vpop.eup %3126 }
 0x3db   : > { %v894_v49 = vmul.f32 %v3127_v48, %v3123_v38 }
 0x3dd   : > { %v895_v50 = vpack.c.bf16 %v894_v49, %v894_v49 }
 0x3df   : > { %2788 = vmatmul.mubr.msk.bf16.vlgmr.msra.gmra.mrb[0].mxu1 %vm837_vm2, %v895_v50 }
 0x3e0   : > { %2799 = vmatprep.mubr.msk.bf16.mxu1 %vm3458_vm0, %v3457_v0 }
 0x442   : > { %v1007_v53 = vpop.xlane.xlu1 %1006 }
 0x443   : > { %3128 = vrcp.f32 %v1007_v53 }
 0x446   : > { %v1012_v54 = vpop.permute.xlu1 %1011 }
 0x447   : > { %v1017_v55 = vsel %vm902_vm3, %v1012_v54, 0 }
 0x448   : > { %2798 = vmatpush3.bf16.msra.mxu1 %v1017_v55 }
 0x449   : > { %2809 = vmatprep.subr.bf16.mxu1 %v3457_v0 }
 0x44a   : > { %v1156_v3 = vpop.permute.xlu1 %1155 }
 0x44b   : > { %v1161_v8 = vsel %vm837_vm2, %v1156_v3, 0 }
 0x44d   : > { %v3129_v56 = vpop.eup %3128 }
 0x44e   : > { %v1009_v58 = vmul.f32 %v3129_v56, %v3125_v45  ;;  %v1154_v10 = vpop.permute.xlu1 %1153 }
 0x450   : > { %v1010_v59 = vpack.c.bf16 %v1009_v58, %v1009_v58  ;;  %v1428_v58 = vsel %vm902_vm3, %v1423_v57, 0 }
 0x452   : > { %2800 = vmatmul.mubr.msk.bf16.vlgmr.msra.gmra.mrb[4].mxu1 %vm837_vm2, %v1010_v59 }
 0x453   : > { %2810 = vmatpush3.bf16.msra.mxu1 %v1111_v60  ;;  %2811 = vmatprep.mubr.msk.bf16.mxu1 %vm3458_vm0, %v3457_v0 }
 0x454   : > { %2821 = vmatprep.subr.bf16.mxu1 %v3457_v0 }
 0x4b2   : > { %v940_v61 = vpop.f32.mrb[0].mxu1 }
 0x4b3   : > { %v946_v62 = vpack.c.bf16 %v940_v61, %v940_v61  ;;  %v2789_v63 = vpop.f32.mrb[1].mxu1 }
 0x4b4   : > { %v943_v1 = vpop.f32.mrb[2].mxu1 }
 0x4b5   : > { %v2790_v2 = vpop.f32.mrb[3].mxu1  ;;  %2812 = vmatmul.mubr.msk.bf16.vlgmr.msra.gmra.mrb[8].mxu1 %vm837_vm2, %v946_v62 }
 0x4b6   : > { %2823 = vmatprep.mubr.msk.bf16.mxu1 %vm3458_vm0, %v3457_v0 }
 0x525   : > { %v1053_v4 = vpop.f32.mrb[4].mxu1 }
 0x526   : > { %v1059_v5 = vpack.c.bf16 %v1053_v4, %v1053_v4  ;;  %v2801_v6 = vpop.f32.mrb[5].mxu1 }
 0x527   : > { %v1056_v7 = vpop.f32.mrb[6].mxu1 }
 0x528   : > { %v2802_v9 = vpop.f32.mrb[7].mxu1  ;;  %2806 = vmatmul.mubr.msk.bf16.vlgmr.msra.gmra.mrb[16].mxu0 %vm837_vm2, %v1059_v5  ;;  %v3108_v7 = vld [vmem:[%s4188_s10] sm:$0xff]  }
 0x529   : > { %2816 = vmatpush3.bf16.xpose.msra.mxu0 %v1161_v8  ;;  %2817 = vmatprep.mubr.msk.bf16.mxu0 %vm3458_vm0, %v3457_v0 }
 0x52a   : > { %2827 = vmatprep.subr.bf16.mxu0 %v3457_v0 }
 0x530   : > { %2818 = vmatmul.mubr.msk.bf16.vlgmr.msra.gmra.mrb[20].mxu0 %vm837_vm2, %v1154_v10 }
 0x531   : > { %2829 = vmatprep.mubr.msk.bf16.mxu0 %vm3458_vm0, %v3457_v0  ;;  %2828 = vmatpush3.bf16.msra.mxu0 %v1269_v41 }
 0x532   : > { %2839 = vmatprep.subr.bf16.mxu0 %v3457_v0 }
 0x588   : > { %v1147_v11 = vpop.f32.mrb[8].mxu1 }
 0x589   : > { %v2813_v12 = vpop.f32.mrb[9].mxu1 }
 0x58a   : > { %v1150_v13 = vpop.f32.mrb[10].mxu1  ;;  %v699_v12 = vld [vmem:[%s693_s25] sm:$0xff] }
 0x58b   : > { %v2814_v14 = vpop.f32.mrb[11].mxu1  ;;  %v3109_v13 = vld [vmem:[%s4188_s10 + $0x8] sm:$0xff]  }
 0x58c   : > { %v1546_v14 = vpack.c.bf16 %v699_v12, %v699_v12  ;;  %v1723_v12 = vld [vmem:[#allocation11] sm:$0xf] }
 0x5fb   : > { %v1101_v15 = vpop.f32.mrb[16].mxu0 }
 0x5fc   : > { %v3916_v16 = vadd.f32 %v1147_v11, %v1101_v15  ;;  %v2807_v17 = vpop.f32.mrb[17].mxu0  ;;  %v3110_v15 = vld [vmem:[#allocation7] sm:$0xff]  }
 0x5fd   : > { %v1104_v19 = vpop.f32.mrb[18].mxu0 }
 0x5fe   : > { %v2808_v20 = vpop.f32.mrb[19].mxu0  ;;  %v2652_v19 = vld [vmem:[#allocation5] ss:$0 sm:$0xff] }
 0x603   : > { %v1197_v22 = vpop.f32.mrb[20].mxu0 }
 0x604   : > { %v2819_v23 = vpop.f32.mrb[21].mxu0  ;;  %v1203_v24 = vsel %vm837_vm2, %v1197_v22, -inf }
 0x605   : > { %1204 = vmax.xlane.f32.xlu0 %v1203_v24  ;;  %v1200_v25 = vpop.f32.mrb[22].mxu0 }
 0x606   : > { %v2820_v26 = vpop.f32.mrb[23].mxu0 }
 0x61b   : > { %1215 = vrot.lane.b32.xlu0 %v3853_v18, %s3463_s1 }
 0x61f   : > { %1314 = vrot.lane.b32.xlu0 %v3853_v18, %s3464_s21 }
 0x623   : > { %1312 = vrot.lane.b32.xlu0 %v3859_v21, %s3464_s21 }
 0x692   : > { %v1205_v27 = vpop.xlane.xlu0 %1204 }
 0x693   : > { %v1206_v28 = vsub.f32 %v1197_v22, %v1205_v27  ;;  %v2657_v27 = vld [vmem:[#allocation10] ss:$0 sm:$0xff] }
 0x695   : > { %v1207_v29 = vmul.f32 1.442695, %v1206_v28 }
 0x696   : > { %v1216_v30 = vpop.permute.xlu0 %1215 }
 0x697   : > { %3130 = vpow2.f32 %v1207_v29  ;;  %v1221_v31 = vsel %vm902_vm3, %v1216_v30, 0 }
 0x698   : > { %2822 = vmatpush3.bf16.msra.mxu1 %v1221_v31 }
 0x699   : > { %2833 = vmatprep.subr.bf16.mxu1 %v3457_v0 }
 0x69a   : > { %v1315_v37 = vpop.permute.xlu0 %1314 }
 0x69b   : > { %v1320_v38 = vsel %vm837_vm2, %v1315_v37, 0 }
 0x69e   : > { %v1313_v39 = vpop.permute.xlu0 %1312 }
 0x6a1   : > { %v3131_v32 = vpop.eup %3130 }
 0x6a2   : > { %v1209_v33 = vsel %vm837_vm2, %v3131_v32, 0.0 }
 0x6a3   : > { %1210 = vadd.xlane.f32.xlu1 %v1209_v33 }
 0x730   : > { %v1211_v34 = vpop.xlane.xlu1 %1210 }
 0x731   : > { %3132 = vrcp.f32 %v1211_v34 }
 0x73b   : > { %v3133_v35 = vpop.eup %3132 }
 0x73c   : > { %v1213_v36 = vmul.f32 %v3133_v35, %v3131_v32  ;;  %v2653_v35 = vld [vmem:[#allocation8] ss:$0 sm:$0xff] }
 0x73e   : > { %v1214_v21 = vpack.c.bf16 %v1213_v36, %v1213_v36 }
 0x740   : > { %2824 = vmatmul.mubr.msk.bf16.vlgmr.msra.gmra.mrb[12].mxu1 %vm837_vm2, %v1214_v21 }
 0x741   : > { %2834 = vmatpush3.bf16.xpose.msra.mxu1 %v1320_v38  ;;  %2835 = vmatprep.mubr.msk.bf16.mxu1 %vm3458_vm0, %v3457_v0 }
 0x742   : > { %2845 = vmatprep.subr.bf16.mxu1 %v3457_v0 }
 0x748   : > { %2836 = vmatmul.mubr.msk.bf16.vlgmr.msra.gmra.mrb[16].mxu1 %vm837_vm2, %v1313_v39 }
 0x749   : > { %2847 = vmatprep.mubr.msk.bf16.mxu1 %vm3458_vm0, %v3457_v0  ;;  %2846 = vmatpush3.bf16.msra.mxu1 %v1428_v58 }
 0x74a   : > { %2859 = vmatprep.subr.bf16.mxu1 %v3457_v0 }
 0x813   : > { %v1257_v42 = vpop.f32.mrb[12].mxu1 }
 0x814   : > { %v1263_v43 = vpack.c.bf16 %v1257_v42, %v1257_v42  ;;  %v2825_v44 = vpop.f32.mrb[13].mxu1 }
 0x815   : > { %v1260_v45 = vpop.f32.mrb[14].mxu1 }
 0x816   : > { %v2826_v46 = vpop.f32.mrb[15].mxu1  ;;  %2830 = vmatmul.mubr.msk.bf16.vlgmr.msra.gmra.mrb[24].mxu0 %vm837_vm2, %v1263_v43 }
 0x817   : > { %2841 = vmatprep.mubr.msk.bf16.mxu0 %vm3458_vm0, %v3457_v0 }
 0x81b   : > { %v1356_v47 = vpop.f32.mrb[16].mxu1 }
 0x81c   : > { %v2837_v48 = vpop.f32.mrb[17].mxu1  ;;  %v1362_v49 = vsel %vm837_vm2, %v1356_v47, -inf }
 0x81d   : > { %1363 = vmax.xlane.f32.xlu0 %v1362_v49  ;;  %v1359_v50 = vpop.f32.mrb[18].mxu1 }
 0x81e   : > { %v2838_v51 = vpop.f32.mrb[19].mxu1 }
 0x8aa   : > { %v1364_v52 = vpop.xlane.xlu0 %1363 }
 0x8ab   : > { %v1365_v53 = vsub.f32 %v1356_v47, %v1364_v52 }
 0x8ad   : > { %v1366_v54 = vmul.f32 1.442695, %v1365_v53 }
 0x8af   : > { %3134 = vpow2.f32 %v1366_v54 }
 0x8b9   : > { %v3135_v55 = vpop.eup %3134 }
 0x8ba   : > { %v1368_v56 = vsel %vm837_vm2, %v3135_v55, 0.0 }
 0x8bb   : > { %1369 = vadd.xlane.f32.xlu1 %v1368_v56 }
 0x8cc   : > { %1374 = vrot.lane.b32.xlu1 %v3853_v18, %s3465_s2 }
 0x8e9   : > { %v1305_v59 = vpop.f32.mrb[24].mxu0 }
 0x8ea   : > { %v1311_v60 = vadd.f32 %v1305_v59, %v3916_v16  ;;  %v2831_v61 = vpop.f32.mrb[25].mxu0  ;;  %v3111_v16 = vld [vmem:[#allocation7 + $0x8] sm:$0xff]  }
 0x8eb   : > { %v1308_v62 = vpop.f32.mrb[26].mxu0 }
 0x8ec   : > { %v2832_v63 = vpop.f32.mrb[27].mxu0 }
 0x948   : > { %v1370_v1 = vpop.xlane.xlu1 %1369 }
 0x949   : > { %3136 = vrcp.f32 %v1370_v1 }
 0x94c   : > { %v1375_v2 = vpop.permute.xlu1 %1374 }
 0x94d   : > { %v1380_v18 = vsel %vm902_vm3, %v1375_v2, 0 }
 0x94e   : > { %2840 = vmatpush3.bf16.msra.mxu0 %v1380_v18 }
 0x94f   : > { %2851 = vmatprep.subr.bf16.mxu0 %v3457_v0 }
 0x953   : > { %v3137_v3 = vpop.eup %3136 }
 0x954   : > { %v1372_v4 = vmul.f32 %v3137_v3, %v3135_v55 }
 0x956   : > { %v1373_v5 = vpack.c.bf16 %v1372_v4, %v1372_v4 }
 0x958   : > { %2842 = vmatmul.mubr.msk.bf16.vlgmr.msra.gmra.mrb[28].mxu0 %vm837_vm2, %v1373_v5 }
 0x959   : > { %2855 = vmatprep.mubr.msk.bf16.mxu0 %vm3458_vm0, %v3457_v0  ;;  %2852 = vmatpush3.bf16.msra.mxu0 %v3110_v15  ;;  %v1887_v15 = vsel %vm902_vm3, %v1723_v12, 0 }
 0x95a   : > { %2853 = vmatprep.subr.bf16.mxu0 %v3457_v0 }
 0x95d   : > { %2854 = vmatpush3.bf16.msra.mxu0 %v3111_v16 }
 0x95e   : > { %2867 = vmatprep.subr.bf16.mxu0 %v3457_v0 }
 0xa2b   : > { %v1416_v6 = vpop.f32.mrb[28].mxu0 }
 0xa2c   : > { %v1422_v8 = vpack.c.bf16 %v1416_v6, %v1416_v6  ;;  %v2843_v9 = vpop.f32.mrb[29].mxu0  ;;  %v1836_v6 = vld [vmem:[#allocation11 + $0x4] sm:$0xf] }
 0xa2d   : > { %v1419_v10 = vpop.f32.mrb[30].mxu0 }
 0xa2e   : > { %v2844_v11 = vpop.f32.mrb[31].mxu0  ;;  %2848 = vmatmul.mubr.msk.bf16.vlgmr.msra.gmra.mrb[20].mxu1 %vm837_vm2, %v1422_v8 }
 0xa2f   : > { %2860 = vmatpush3.bf16.msra.mxu1 %v3108_v7  ;;  %2863 = vmatprep.mubr.msk.bf16.mxu1 %vm3458_vm0, %v3457_v0  ;;  %v1841_v7 = vsel %vm902_vm3, %v1836_v6, 0 }
 0xa30   : > { %2861 = vmatprep.subr.bf16.mxu1 %v3457_v0 }
 0xa33   : > { %2862 = vmatpush3.bf16.msra.mxu1 %v3109_v13 }
 0xa34   : > { %2873 = vmatprep.subr.bf16.mxu1 %v3457_v0 }
 0xa36   : > { %2864 = vmatmul.mubr.msk.bf16.vlgmr.msra.gmra.mrb[24].mxu1 %vm724_vm1, %v1546_v14 }
 0xa37   : > { %2875 = vmatprep.mubr.msk.bf16.mxu1 %vm3458_vm0, %v3457_v0 }
 0xb01   : > { %v1464_v17 = vpop.f32.mrb[20].mxu1 }
 0xb02   : > { %v1470_v20 = vadd.f32 %v1464_v17, %v1311_v60  ;;  %v2849_v22 = vpop.f32.mrb[21].mxu1 }
 0xb03   : > { %v1467_v23 = vpop.f32.mrb[22].mxu1 }
 0xb04   : > { %v1478_v24 = vadd.f32 %v2652_v19, %v1470_v20  ;;  %v2850_v25 = vpop.f32.mrb[23].mxu1 }
 0xb06   : > { %v1479_v26 = vpack.c.bf16 %v1478_v24, %v1478_v24 }
 0xb08   : > { %2856 = vmatmul.mubr.msk.bf16.vlgmr.msra.gmra.mrb[32].mxu0 %vm724_vm1, %v1479_v26 }
 0xb09   : > { %v1607_v28 = vpop.f32.mrb[24].mxu1  ;;  %2869 = vmatprep.mubr.msk.bf16.mxu0 %vm3458_vm0, %v3457_v0 }
 0xb0a   : > { %v1608_v29 = vadd.f32 %v2657_v27, %v1607_v28  ;;  %v2865_v30 = vpop.f32.mrb[25].mxu1 }
 0xb0b   : > { %v1610_v31 = vpop.f32.mrb[26].mxu1 }
 0xb0c   : > { %v3983_v32 = vpack.c.bf16 %v1608_v29, %v1608_v29  ;;  %v2866_v33 = vpop.f32.mrb[27].mxu1 }
 0xb0e   : > { %1727 = vrot.lane.b32.xlu1 %v3983_v32, %s3459_s22  ;;  %v1619_v34 = vsel %vm837_vm2, %v3983_v32, 0 }
 0xb0f   : > { %2868 = vmatpush3.bf16.xpose.msra.mxu0 %v1619_v34 }
 0xb10   : > { %2879 = vmatprep.subr.bf16.mxu0 %v3457_v0 }
 0xb80   : > { %v1728_v37 = vpop.permute.xlu1 %1727 }
 0xb81   : > { %v1733_v42 = vsel %vm837_vm2, %v1728_v37, 0 }
 0xbdb   : > { %v1540_v36 = vpop.f32.mrb[32].mxu0 }
 0xbdc   : > { %v1541_v21 = vadd.f32 %v2653_v35, %v1540_v36  ;;  %v2857_v38 = vpop.f32.mrb[33].mxu0 }
 0xbdd   : > { %v1543_v39 = vpop.f32.mrb[34].mxu0 }
 0xbde   : > { %v3990_v40 = vpack.c.bf16 %v1541_v21, %v1541_v21  ;;  %v2858_v41 = vpop.f32.mrb[35].mxu0 }
 0xbe0   : > { %1725 = vrot.lane.b32.xlu1 %v3990_v40, %s3459_s22  ;;  %2870 = vmatmul.mubr.msk.bf16.vlgmr.msra.gmra.mrb[36].mxu0 %vm837_vm2, %v3990_v40 }
 0xbe1   : > { %2880 = vmatpush3.bf16.xpose.msra.mxu0 %v1733_v42  ;;  %2881 = vmatprep.mubr.msk.bf16.mxu0 %vm3458_vm0, %v3457_v0 }
 0xbe2   : > { %2891 = vmatprep.subr.bf16.mxu0 %v3457_v0 }
 0xc52   : > { %v1726_v43 = vpop.permute.xlu1 %1725 }
 0xc53   : > { %2882 = vmatmul.mubr.msk.bf16.vlgmr.msra.gmra.mrb[40].mxu0 %vm837_vm2, %v1726_v43 }
 0xc54   : > { %2893 = vmatprep.mubr.msk.bf16.mxu0 %vm3458_vm0, %v3457_v0  ;;  %2892 = vmatpush3.bf16.msra.mxu0 %v1841_v7 }
 0xc55   : > { %2903 = vmatprep.subr.bf16.mxu0 %v3457_v0 }
 0xcb3   : > { %v1655_v44 = vpop.f32.mrb[36].mxu0 }
 0xcb4   : > { %v2871_v45 = vpop.f32.mrb[37].mxu0  ;;  %v1661_v46 = vsel %vm837_vm2, %v1655_v44, -inf }
 0xcb5   : > { %1662 = vmax.xlane.f32.xlu0 %v1661_v46  ;;  %v1658_v47 = vpop.f32.mrb[38].mxu0 }
 0xcb6   : > { %v2872_v48 = vpop.f32.mrb[39].mxu0 }
 0xccb   : > { %1674 = vrot.lane.b32.xlu0 %v3983_v32, %s3460_s20  ;;  %s3466_s20 = smov [#allocation14]  }
 0xd26   : > { %v1769_v49 = vpop.f32.mrb[40].mxu0 }
 0xd27   : > { %v2883_v50 = vpop.f32.mrb[41].mxu0  ;;  %v1775_v51 = vsel %vm837_vm2, %v1769_v49, -inf }
 0xd28   : > { %1776 = vmax.xlane.f32.xlu1 %v1775_v51  ;;  %v1772_v52 = vpop.f32.mrb[42].mxu0 }
 0xd29   : > { %v2884_v53 = vpop.f32.mrb[43].mxu0 }
 0xd39   : > { %1929 = vrot.lane.b32.xlu1 %v3990_v40, %s3462_s9 }
 0xd42   : > { %v1663_v54 = vpop.xlane.xlu0 %1662 }
 0xd43   : > { %v1664_v55 = vsub.f32 %v1655_v44, %v1663_v54 }
 0xd45   : > { %v1665_v56 = vmul.f32 1.442695, %v1664_v55 }
 0xd46   : > { %v1675_v57 = vpop.permute.xlu0 %1674 }
 0xd47   : > { %3138 = vpow2.f32 %v1665_v56  ;;  %v1680_v58 = vsel %vm902_vm3, %v1675_v57, 0 }
 0xd48   : > { %2874 = vmatpush3.bf16.msra.mxu1 %v1680_v58 }
 0xd49   : > { %2885 = vmatprep.subr.bf16.mxu1 %v3457_v0 }
 0xd51   : > { %v3139_v59 = vpop.eup %3138 }
 0xd52   : > { %v1667_v60 = vsel %vm837_vm2, %v3139_v59, 0.0 }
 0xd53   : > { %1668 = vadd.xlane.f32.xlu0 %v1667_v60 }
 0xdb5   : > { %v1777_v61 = vpop.xlane.xlu1 %1776 }
 0xdb6   : > { %v1778_v62 = vsub.f32 %v1769_v49, %v1777_v61 }
 0xdb8   : > { %v1779_v63 = vmul.f32 1.442695, %v1778_v62 }
 0xdb9   : > { %v1930_v30 = vpop.permute.xlu1 %1929 }
 0xdba   : > { %3140 = vpow2.f32 %v1779_v63 }
 0xdc4   : > { %v3141_v1 = vpop.eup %3140 }
 0xdc5   : > { %v1781_v2 = vsel %vm837_vm2, %v3141_v1, 0.0 }
 0xdc6   : > { %1782 = vadd.xlane.f32.xlu0 %v1781_v2 }
 0xddc   : > { %1787 = vrot.lane.b32.xlu0 %v3983_v32, %s3461_s17  ;;  %s3356_s17 = sshll.u32 %s3466_s20, 4  ;;  %s3357_s17 = int_to_ptr.vmem [resolvable:$false] %s3356_s17 }
 0xde0   : > { %v1669_v18 = vpop.xlane.xlu0 %1668  ;;  %1931 = vrot.lane.b32.xlu0 %v3983_v32, %s3462_s9  ;;  %s4243_s9 = sld [smem:[#allocation21_spill]] }
 0xde1   : > { %3142 = vrcp.f32 %v1669_v18 }
 0xdeb   : > { %v3143_v3 = vpop.eup %3142 }
 0xdec   : > { %v1671_v4 = vmul.f32 %v3143_v3, %v3139_v59  ;;  %v2040_v59 = vld [vmem:[#allocation11 + $0x8] sm:$0xf] }
 0xded   : > { %v2045_v60 = vsel %vm902_vm3, %v2040_v59, 0 }
 0xdee   : > { %v1672_v5 = vpack.c.bf16 %v1671_v4, %v1671_v4 }
 0xdf0   : > { %2876 = vmatmul.mubr.msk.bf16.vlgmr.msra.gmra.mrb[28].mxu1 %vm837_vm2, %v1672_v5 }
 0xdf1   : > { %2887 = vmatprep.mubr.msk.bf16.mxu1 %vm3458_vm0, %v3457_v0 }
 0xe53   : > { %v1783_v8 = vpop.xlane.xlu0 %1782 }
 0xe54   : > { %3144 = vrcp.f32 %v1783_v8 }
 0xe57   : > { %v1788_v9 = vpop.permute.xlu0 %1787 }
 0xe58   : > { %v1793_v10 = vsel %vm902_vm3, %v1788_v9, 0 }
 0xe59   : > { %2886 = vmatpush3.bf16.msra.mxu1 %v1793_v10 }
 0xe5a   : > { %2897 = vmatprep.subr.bf16.mxu1 %v3457_v0 }
 0xe5b   : > { %v1932_v23 = vpop.permute.xlu0 %1931 }
 0xe5c   : > { %v1937_v28 = vsel %vm837_vm2, %v1932_v23, 0 }
 0xe5e   : > { %v3145_v11 = vpop.eup %3144 }
 0xe5f   : > { %v1785_v13 = vmul.f32 %v3145_v11, %v3141_v1 }
 0xe61   : > { %v1786_v14 = vpack.c.bf16 %v1785_v13, %v1785_v13 }
 0xe63   : > { %2888 = vmatmul.mubr.msk.bf16.vlgmr.msra.gmra.mrb[32].mxu1 %vm837_vm2, %v1786_v14  ;;  %v2199_v14 = vld [vmem:[#allocation11 + $0xc] sm:$0xf] }
 0xe64   : > { %2898 = vmatpush3.bf16.msra.mxu1 %v1887_v15  ;;  %2899 = vmatprep.mubr.msk.bf16.mxu1 %vm3458_vm0, %v3457_v0  ;;  %v2204_v15 = vsel %vm902_vm3, %v2199_v14, 0 }
 0xe65   : > { %2909 = vmatprep.subr.bf16.mxu1 %v3457_v0 }
 0xec3   : > { %v1716_v16 = vpop.f32.mrb[28].mxu1 }
 0xec4   : > { %v1722_v17 = vpack.c.bf16 %v1716_v16, %v1716_v16  ;;  %v2877_v19 = vpop.f32.mrb[29].mxu1 }
 0xec5   : > { %v1719_v20 = vpop.f32.mrb[30].mxu1 }
 0xec6   : > { %v2878_v22 = vpop.f32.mrb[31].mxu1  ;;  %2900 = vmatmul.mubr.msk.bf16.vlgmr.msra.gmra.mrb[36].mxu1 %vm837_vm2, %v1722_v17 }
 0xec7   : > { %2911 = vmatprep.mubr.msk.bf16.mxu1 %vm3458_vm0, %v3457_v0 }
 0xf36   : > { %v1829_v24 = vpop.f32.mrb[32].mxu1 }
 0xf37   : > { %v1835_v25 = vpack.c.bf16 %v1829_v24, %v1829_v24  ;;  %v2889_v26 = vpop.f32.mrb[33].mxu1 }
 0xf38   : > { %v1832_v27 = vpop.f32.mrb[34].mxu1 }
 0xf39   : > { %v2890_v29 = vpop.f32.mrb[35].mxu1  ;;  %2894 = vmatmul.mubr.msk.bf16.vlgmr.msra.gmra.mrb[44].mxu0 %vm837_vm2, %v1835_v25 }
 0xf3a   : > { %2904 = vmatpush3.bf16.xpose.msra.mxu0 %v1937_v28  ;;  %2905 = vmatprep.mubr.msk.bf16.mxu0 %vm3458_vm0, %v3457_v0 }
 0xf3b   : > { %2915 = vmatprep.subr.bf16.mxu0 %v3457_v0 }
 0xf41   : > { %2906 = vmatmul.mubr.msk.bf16.vlgmr.msra.gmra.mrb[48].mxu0 %vm837_vm2, %v1930_v30 }
 0xf42   : > { %2917 = vmatprep.mubr.msk.bf16.mxu0 %vm3458_vm0, %v3457_v0  ;;  %2916 = vmatpush3.bf16.msra.mxu0 %v2045_v60 }
 0xf43   : > { %2927 = vmatprep.subr.bf16.mxu0 %v3457_v0 }
 0xf99   : > { %v1923_v31 = vpop.f32.mrb[36].mxu1 }
 0xf9a   : > { %v2901_v33 = vpop.f32.mrb[37].mxu1 }
 0xf9b   : > { %v1926_v34 = vpop.f32.mrb[38].mxu1  ;;  %v3113_v33 = vld [vmem:[%s4192_s14 + $0x8] sm:$0xff]  }
 0xf9c   : > { %v2902_v35 = vpop.f32.mrb[39].mxu1  ;;  %v3114_v34 = vld [vmem:[%s4194_s16] sm:$0xff]  }
0x100c   : > { %v1877_v36 = vpop.f32.mrb[44].mxu0 }
0x100d   : > { %v4040_v37 = vadd.f32 %v1923_v31, %v1877_v36  ;;  %v2895_v21 = vpop.f32.mrb[45].mxu0  ;;  %v3112_v31 = vld [vmem:[%s4192_s14] sm:$0xff]   ;;  %v2673_v36 = vld [vmem:[#allocation13] ss:$0 sm:$0xff] }
0x100e   : > { %v1880_v38 = vpop.f32.mrb[46].mxu0 }
0x100f   : > { %v2896_v39 = vpop.f32.mrb[47].mxu0 }
0x1014   : > { %v1973_v41 = vpop.f32.mrb[48].mxu0 }
0x1015   : > { %v2907_v42 = vpop.f32.mrb[49].mxu0  ;;  %v1979_v43 = vsel %vm837_vm2, %v1973_v41, -inf }
0x1016   : > { %1980 = vmax.xlane.f32.xlu0 %v1979_v43  ;;  %v1976_v44 = vpop.f32.mrb[50].mxu0  ;;  %v3115_v43 = vld [vmem:[%s4194_s16 + $0x8] sm:$0xff]  }
0x1017   : > { %v2908_v45 = vpop.f32.mrb[51].mxu0  ;;  %v3116_v44 = vld [vmem:[%s4194_s16 + $0x10] sm:$0xff]  }
0x1018   : > { %v3117_v45 = vld [vmem:[%s4194_s16 + $0x18] sm:$0xff]  }
0x102c   : > { %1991 = vrot.lane.b32.xlu0 %v3983_v32, %s3463_s1  ;;  %s683_s1 = sand.u32 1, %s4243_s9   ;;  %s3358_s9 = scalar_lea.vmem %s3357_s17, 256 }
0x102d   : > { %s2445_s30 = scalar_lea.sflag [#allocation4], %s683_s1 }
0x1030   : > { %2088 = vrot.lane.b32.xlu0 %v3990_v40, %s3464_s21 }
0x10a3   : > { %v1981_v46 = vpop.xlane.xlu0 %1980 }
0x10a4   : > { %v1982_v47 = vsub.f32 %v1973_v41, %v1981_v46  ;;  %v3118_v46 = vld [vmem:[%s4194_s16 + $0x20] sm:$0xff]  }
0x10a6   : > { %v1983_v48 = vmul.f32 1.442695, %v1982_v47  ;;  %v3119_v47 = vld [vmem:[%s4194_s16 + $0x28] sm:$0xff]  }
0x10a7   : > { %v1992_v49 = vpop.permute.xlu0 %1991 }
0x10a8   : > { %3146 = vpow2.f32 %v1983_v48  ;;  %v1997_v50 = vsel %vm902_vm3, %v1992_v49, 0  ;;  %v3120_v48 = vld [vmem:[%s4194_s16 + $0x30] sm:$0xff]   ;;  %v3121_v49 = vld [vmem:[%s4194_s16 + $0x38] sm:$0xff]  }
0x10a9   : > { %2910 = vmatpush3.bf16.msra.mxu1 %v1997_v50  ;;  %v2674_v50 = vld [vmem:[%s4193_s15] ss:$0 sm:$0xff] }
0x10aa   : > { %2921 = vmatprep.subr.bf16.mxu1 %v3457_v0 }
0x10ab   : > { %v2089_v58 = vpop.permute.xlu0 %2088 }
0x10b2   : > { %v3147_v51 = vpop.eup %3146 }
0x10b3   : > { %v1985_v52 = vsel %vm837_vm2, %v3147_v51, 0.0 }
0x10b4   : > { %1986 = vadd.xlane.f32.xlu1 %v1985_v52 }
0x10c5   : > { %2090 = vrot.lane.b32.xlu1 %v3983_v32, %s3464_s21  ;;  %s2629_s21 = sshll.u32 %s683_s1, 3 }
0x10c6   : > { %s685_s29 = scalar_lea.vmem [#allocation14], %s2629_s21 }
0x10c7   : > { %s2459_s25 = sshll.u32 %s685_s29, 4  ;;  %s4132_s25 = int_to_ptr.vmem [resolvable:$true] %s2459_s25 }
0x10c8   : > { %s3352_s22 = scalar_lea.vmem %s4132_s25, 128  ;;  %p3359_p11 = scmp.lt.s32.totalorder %s4132_s25, %s3357_s17 }
0x10c9   : > { %p3353_p2 = scmp.ne.s32.totalorder %s4132_s25, %s3352_s22  ;;  %p3360_p3 = scmp.lt.s32.totalorder %s3358_s9, %s3352_s22 }
0x10cb   : > { %p3354_p8 = pnand %p3353_p2, %p4247_p4  ;;  %p3361_p5 = por %p3360_p3, %p3359_p11 }
0x10cd   : > { %p3355_p10 = pneg %p3354_p8 }
0x10cf   : > { %p3362_p6 = pnand %p3361_p5, %p3355_p10 }
0x1141   : > { %v1987_v53 = vpop.xlane.xlu1 %1986 }
0x1142   : > { %3148 = vrcp.f32 %v1987_v53 }
0x1145   : > { %v2091_v55 = vpop.permute.xlu1 %2090 }
0x1146   : > { %v2096_v57 = vsel %vm837_vm2, %v2091_v55, 0 }
0x114c   : > { %v3149_v40 = vpop.eup %3148 }
0x114d   : > { %v1989_v54 = vmul.f32 %v3149_v40, %v3147_v51 }
0x114f   : > { %v1990_v56 = vpack.c.bf16 %v1989_v54, %v1989_v54 }
0x1151   : > { %2912 = vmatmul.mubr.msk.bf16.vlgmr.msra.gmra.mrb[40].mxu1 %vm837_vm2, %v1990_v56 }
0x1152   : > { %2922 = vmatpush3.bf16.xpose.msra.mxu1 %v2096_v57  ;;  %2923 = vmatprep.mubr.msk.bf16.mxu1 %vm3458_vm0, %v3457_v0 }
0x1153   : > { %2933 = vmatprep.subr.bf16.mxu1 %v3457_v0 }
0x1159   : > { %2924 = vmatmul.mubr.msk.bf16.vlgmr.msra.gmra.mrb[44].mxu1 %vm837_vm2, %v2089_v58 }
0x115a   : > { %2935 = vmatprep.mubr.msk.bf16.mxu1 %vm3458_vm0, %v3457_v0  ;;  %2934 = vmatpush3.bf16.msra.mxu1 %v2204_v15 }
0x115b   : > { %2947 = vmatprep.subr.bf16.mxu1 %v3457_v0 }
0x1224   : > { %v2033_v61 = vpop.f32.mrb[40].mxu1 }
0x1225   : > { %v2039_v62 = vpack.c.bf16 %v2033_v61, %v2033_v61  ;;  %v2913_v63 = vpop.f32.mrb[41].mxu1 }
0x1226   : > { %v2036_v1 = vpop.f32.mrb[42].mxu1 }
0x1227   : > { %v2914_v2 = vpop.f32.mrb[43].mxu1  ;;  %2918 = vmatmul.mubr.msk.bf16.vlgmr.msra.gmra.mrb[52].mxu0 %vm837_vm2, %v2039_v62  ;;  %v2678_v1 = vld [vmem:[%s4244_s23] ss:$0 sm:$0xff] }
0x1228   : > { %2929 = vmatprep.mubr.msk.bf16.mxu0 %vm3458_vm0, %v3457_v0 }
0x122c   : > { %v2132_v18 = vpop.f32.mrb[44].mxu1 }
0x122d   : > { %v2925_v3 = vpop.f32.mrb[45].mxu1  ;;  %v2138_v4 = vsel %vm837_vm2, %v2132_v18, -inf }
0x122e   : > { %2139 = vmax.xlane.f32.xlu0 %v2138_v4  ;;  %v2135_v5 = vpop.f32.mrb[46].mxu1 }
0x122f   : > { %v2926_v6 = vpop.f32.mrb[47].mxu1 }
0x1244   : > { %2150 = vrot.lane.b32.xlu0 %v3983_v32, %s3465_s2 }
0x12bb   : > { %v2140_v7 = vpop.xlane.xlu0 %2139 }
0x12bc   : > { %v2141_v8 = vsub.f32 %v2132_v18, %v2140_v7 }
0x12be   : > { %v2142_v9 = vmul.f32 1.442695, %v2141_v8 }
0x12bf   : > { %v2151_v10 = vpop.permute.xlu0 %2150 }
0x12c0   : > { %3150 = vpow2.f32 %v2142_v9  ;;  %v2156_v11 = vsel %vm902_vm3, %v2151_v10, 0 }
0x12c1   : > { %2928 = vmatpush3.bf16.msra.mxu0 %v2156_v11 }
0x12c2   : > { %2939 = vmatprep.subr.bf16.mxu0 %v3457_v0 }
0x12ca   : > { %v3151_v12 = vpop.eup %3150 }
0x12cb   : > { %v2144_v13 = vsel %vm837_vm2, %v3151_v12, 0.0 }
0x12cc   : > { %2145 = vadd.xlane.f32.xlu1 %v2144_v13 }
0x12fa   : > { %v2081_v32 = vpop.f32.mrb[52].mxu0 }
0x12fb   : > { %v2087_v16 = vadd.f32 %v2081_v32, %v4040_v37  ;;  %v2919_v17 = vpop.f32.mrb[53].mxu0 }
0x12fc   : > { %v2084_v19 = vpop.f32.mrb[54].mxu0 }
0x12fd   : > { %v2920_v20 = vpop.f32.mrb[55].mxu0 }
0x1359   : > { %v2146_v22 = vpop.xlane.xlu1 %2145 }
0x135a   : > { %3152 = vrcp.f32 %v2146_v22 }
0x1364   : > { %v3153_v23 = vpop.eup %3152 }
0x1365   : > { %v2148_v24 = vmul.f32 %v3153_v23, %v3151_v12 }
0x1367   : > { %v2149_v25 = vpack.c.bf16 %v2148_v24, %v2148_v24 }
0x1369   : > { %2930 = vmatmul.mubr.msk.bf16.vlgmr.msra.gmra.mrb[56].mxu0 %vm837_vm2, %v2149_v25 }
0x136a   : > { %2943 = vmatprep.mubr.msk.bf16.mxu0 %vm3458_vm0, %v3457_v0  ;;  %2940 = vmatpush3.bf16.msra.mxu0 %v3112_v31 }
0x136b   : > { %2941 = vmatprep.subr.bf16.mxu0 %v3457_v0 }
0x136e   : > { %2942 = vmatpush3.bf16.msra.mxu0 %v3113_v33 }
0x143c   : > { %v2192_v26 = vpop.f32.mrb[56].mxu0 }
0x143d   : > { %v2198_v27 = vpack.c.bf16 %v2192_v26, %v2192_v26  ;;  %v2931_v28 = vpop.f32.mrb[57].mxu0 }
0x143e   : > { %v2195_v29 = vpop.f32.mrb[58].mxu0 }
0x143f   : > { %v2932_v30 = vpop.f32.mrb[59].mxu0  ;;  %2936 = vmatmul.mubr.msk.bf16.vlgmr.msra.gmra.mrb[48].mxu1 %vm837_vm2, %v2198_v27 }
0x1440   : > { %2963 = vmatprep.mubr.msk.bf16.mxu1 %vm3458_vm0, %v3457_v0  ;;  %2948 = vmatpush3.bf16.msra.mxu1 %v3114_v34 }
0x1441   : > { %2949 = vmatprep.subr.bf16.mxu1 %v3457_v0 }
0x1444   : > { %2950 = vmatpush3.bf16.msra.mxu1 %v3115_v43 }
0x1445   : > { %2951 = vmatprep.subr.bf16.mxu1 %v3457_v0 }
0x1448   : > { %2952 = vmatpush3.bf16.msra.mxu1 %v3116_v44 }
0x1449   : > { %2953 = vmatprep.subr.bf16.mxu1 %v3457_v0 }
0x144c   : > { %2954 = vmatpush3.bf16.msra.mxu1 %v3117_v45 }
0x144d   : > { %2955 = vmatprep.subr.bf16.mxu1 %v3457_v0 }
0x1450   : > { %2956 = vmatpush3.bf16.msra.mxu1 %v3118_v46 }
0x1451   : > { %2957 = vmatprep.subr.bf16.mxu1 %v3457_v0 }
0x1454   : > { %2958 = vmatpush3.bf16.msra.mxu1 %v3119_v47 }
0x1455   : > { %2959 = vmatprep.subr.bf16.mxu1 %v3457_v0 }
0x1458   : > { %2960 = vmatpush3.bf16.msra.mxu1 %v3120_v48 }
0x1459   : > { %2961 = vmatprep.subr.bf16.mxu1 %v3457_v0 }
0x145c   : > { %2962 = vmatpush3.bf16.msra.mxu1 %v3121_v49 }
0x1512   : > { %v2240_v35 = vpop.f32.mrb[48].mxu1 }
0x1513   : > { %v2246_v37 = vadd.f32 %v2240_v35, %v2087_v16  ;;  %v2937_v21 = vpop.f32.mrb[49].mxu1 }
0x1514   : > { %v2243_v38 = vpop.f32.mrb[50].mxu1 }
0x1515   : > { %v2254_v39 = vadd.f32 %v2673_v36, %v2246_v37  ;;  %v2938_v41 = vpop.f32.mrb[51].mxu1 }
0x1517   : > { %v2255_v42 = vpack.c.bf16 %v2254_v39, %v2254_v39 }
0x1519   : > { %2944 = vmatmul.mubr.msk.bf16.vlgmr.msra.gmra.mrb[60].mxu0 %vm724_vm1, %v2255_v42 }
0x15ec   : > { %v2316_v51 = vpop.f32.mrb[60].mxu0 }
0x15ed   : > { %v2317_v52 = vadd.f32 %v2674_v50, %v2316_v51  ;;  %v2945_v53 = vpop.f32.mrb[61].mxu0 }
0x15ee   : > { %v2319_v40 = vpop.f32.mrb[62].mxu0 }
0x15ef   : > { %v2323_v54 = vmul.f32 0.044715, %v2317_v52  ;;  %v2946_v55 = vpop.f32.mrb[63].mxu0  ;;  %v2322_v0 = vmul.f32 0.5, %v2317_v52 }
0x15f1   : > { %v2324_v56 = vmul.f32 %v2323_v54, %v2317_v52 }
0x15f3   : > { %v2325_v57 = vmul.f32 %v2324_v56, %v2317_v52 }
0x15f5   : > { %v2326_v58 = vadd.f32 %v2325_v57, %v2317_v52 }
0x15f7   : > { %v2327_v59 = vmul.f32 0.7978846, %v2326_v58 }
0x15f9   : > { %3154 = vtanh.f32 %v2327_v59 }
0x1603   : > { %v3155_v60 = vpop.eup %3154 }
0x1604   : > { %v2329_v61 = vadd.f32 1.0, %v3155_v60 }
0x1606   : > { %v2330_v62 = vmul.f32 %v2329_v61, %v2322_v0 }
0x1608   : > { %v2331_v63 = vpack.c.bf16 %v2330_v62, %v2330_v62 }
0x160a   : > { %2964 = vmatmul.mubr.bf16.vlgmr.msra.gmra.mrb[52].mxu1 %v2331_v63 }
0x16dd   : > { %v2437_v2 = vpop.f32.mrb[52].mxu1 }
0x16de   : > { %v2438_v18 = vadd.f32 %v2678_v1, %v2437_v2  ;;  %v2965_v3 = vpop.f32.mrb[53].mxu1 }
0x16df   : > { %v2440_v4 = vpop.f32.mrb[54].mxu1 }
0x16e0   : > { %v2966_v5 = vpop.f32.mrb[55].mxu1  ;;  %2443 = vst.msk [vmem:[%s685_s29] sm:$0xff] %vm724_vm1, %v2438_v18 }
0x16e1   : > { %3365 = shalt.err (!%p3362_p6)
}
0x16e2   : > { %s3366_s1 = scalar_lea.hbm %s4130_s27, 128  ;;  %s3370_s28 = scalar_lea.hbm %s4246_s26, 256 }
0x16e3   : > { %p3367_p7 = scmp.ne.s32.totalorder %s4130_s27, %s3366_s1  ;;  %p3371_p0 = scmp.lt.u32.totalorder %s4130_s27, %s4246_s26 }
0x16e4   : > { %p3372_p1 = scmp.lt.u32.totalorder %s3370_s28, %s3366_s1  ;;  %p3374_p2 = scmp.lt.u32.totalorder %s3366_s1, %s4130_s27 }
0x16e5   : > { %p3368_p9 = pnand %p3367_p7, %p4247_p4 }
0x16e6   : > { %p3373_p13 = por %p3372_p1, %p3371_p0 }
0x16e7   : > { %p3369_p12 = pneg %p3368_p9 }
0x16e8   : > { %p3375_p8 = por %p3374_p2, %p3373_p13 }
0x16ea   : > { %p3376_p10 = pnand %p3375_p8, %p3369_p12 }
0x16ec   : > { %3379 = shalt.err (!%p3376_p10)
}
0x16ed   : > { %2995 = dma.vmem_to_hbm [thread:$0]  (%p4247_p4), %s4132_s25, 128, %s4130_s27, %s2445_s30  }
0x16ee PF: > { %s4248_s29 = sld [smem:[#allocation24_spill]]  ;;  %s4249_s24 = sld [smem:[#allocation20_spill]] }
0x16ef   : > { %s4250_s19 = sld [smem:[#allocation27_spill]] }
0x16f4   : > { %p3037_p11 = scmp.ge.s32.totalorder %s4248_s29, 2  ;;  %s2471_s22 = sand.u32 1, %s4249_s24  }
0x16f5   : > { %p4251_p3 = scmp.ne.s32.totalorder %s4250_s19, 0  ;;  %s2472_s20 = scalar_lea.sflag [#allocation4], %s2471_s22 }
0x16f7   : > { %p3020_p5 = pnand %p3037_p11, %p4251_p3 }
0x16f9   : > { %3421 = dma.done.wait (!%p3020_p5), %s2472_s20, 128  }
0x16fa   : > { %3423 = vsyncadd (!%p3020_p5), %s2472_s20, 4294967168  ;;  %s35_s19 = sadd.s32 1, %s4248_s29   ;;  %s4252_s27 = sld [smem:[#allocation21_spill]] }
0x16fb   : > { %p32_p6 = scmp.ge.s32.totalorder %s35_s19, 4   ;;  %s4253_s28 = sld [smem:[#allocation22_spill]] }
0x16fc   : > { %s4254_s29 = sld [smem:[#allocation28_spill]]  ;;  %s4255_s30 = sld [smem:[#allocation23_spill]] }
0x16fd   : > { %s4256_s0 = sld [smem:[#allocation25_spill]]  ;;  %34 = sbr.rel (!%p32_p6) target bundleno = 16 (0x10), region = 160 }
0x1704   :  { %2477 = vsyncpa [#allocation3], 1 }
0x1705   :  { %2479 = vsyncpa [#allocation3 + $0x1], 1 }
0x1706   :  { %2480 = vsyncpa [#allocation6], 1 }
0x1707   :  { %2481 = vsyncpa [#allocation9], 1 }
0x1708   :  { %2482 = vsyncpa [#allocation12], 1 }
0x1709   :  { %2483 = vsyncpa [#allocation4], 1 }
0x170a   :  { %2485 = vsyncpa [#allocation4 + $0x1], 1 }

</bundles_post_ra>
